<compile_context>
chip_gen: v6e
topology: v6e:2x2x1
jax: 0.10.0
libtpu: 0.0.40
codegen_flags: <defaults>
</compile_context>

<pallas_src>
import jax
import jax.numpy as jnp
from jax.experimental import pallas as pl
from jax.experimental.pallas import tpu as pltpu

C_IN = 3
C_OUT = 3
K = 3


def conv3x3_kernel(w_ref, b_ref, x_ref, o_ref):
    # w_ref: SMEM f32[81]   (flattened [oc, ic, kh, kw])
    # b_ref: SMEM f32[3]
    # x_ref: VMEM f32[C_IN, H_in, W_in]   (whole packed batch; resident across row tiles)
    # o_ref: VMEM f32[C_OUT, TH, WL]      (one row-tile of the packed output)
    TH = o_ref.shape[1]          # output rows per grid step (multiple of 8)
    WL = o_ref.shape[2]          # output lane width (multiple of 128)
    row0 = pl.multiple_of(pl.program_id(0) * TH, TH)

    # 9 independent partial accumulators (one per (oc, ic)) -> ILP over the VALU slots.
    acc = [[None] * C_IN for _ in range(C_OUT)]
    for oc in range(C_OUT):
        for ic in range(C_IN):
            if ic == 0:
                acc[oc][ic] = jnp.full((TH, WL), b_ref[oc], dtype=jnp.float32)
            else:
                acc[oc][ic] = jnp.zeros((TH, WL), dtype=jnp.float32)

    for ic in range(C_IN):
        # One load per input channel: (TH + 2) rows x (WL + 2) lanes (halo included).
        xc = x_ref[ic, pl.ds(row0, TH + K - 1), :]
        for dh in range(K):
            for dw in range(K):
                # Shifted window computed once, reused by all 3 output channels.
                slab = xc[dh:dh + TH, dw:dw + WL]
                for oc in range(C_OUT):
                    w = w_ref[oc * (C_IN * K * K) + ic * (K * K) + dh * K + dw]
                    acc[oc][ic] = acc[oc][ic] + w * slab

    for oc in range(C_OUT):
        o_ref[oc, :, :] = (acc[oc][0] + acc[oc][1] + acc[oc][2]).astype(o_ref.dtype)


def conv2d_3x3(x, weight, bias, *, th_out=8):
    """x: [N, 3, H, W] f32; weight: [3, 3, 3, 3] f32; bias: [3] f32.
    Returns [N, 3, H-2, W-2] f32 (valid conv, stride 1) — matches nn.Conv2d(3, 3, 3)."""
    N, C, H, W = x.shape
    assert C == C_IN and H > K - 1 and W > K - 1
    assert th_out % 8 == 0
    Ho, Wo = H - (K - 1), W - (K - 1)

    # ---- lane-dense packing: [N, C, H, W] -> [C, H, N*W], zero-padded ----
    num_row_tiles = pl.cdiv(Ho, th_out)
    Ho_pad = num_row_tiles * th_out              # padded output rows
    H_in = Ho_pad + (K - 1)                      # padded input rows (>= H)
    W_lane = max(128, ((N * W + 127) // 128) * 128)  # output lane width, multiple of 128
    W_in = W_lane + (K - 1)                      # padded input lane width

    xp = jnp.transpose(x.astype(jnp.float32), (1, 2, 0, 3)).reshape(C_IN, H, N * W)
    xp = jnp.pad(xp, ((0, 0), (0, H_in - H), (0, W_in - N * W)))

    w_flat = weight.reshape(-1).astype(jnp.float32)
    b = bias.astype(jnp.float32)

    out_packed = pl.pallas_call(
        conv3x3_kernel,
        out_shape=jax.ShapeDtypeStruct((C_OUT, Ho_pad, W_lane), jnp.float32),
        grid_spec=pltpu.PrefetchScalarGridSpec(
            num_scalar_prefetch=0,
            grid=(num_row_tiles,),
            in_specs=[
                pl.BlockSpec(memory_space=pltpu.MemorySpace.SMEM),   # weights
                pl.BlockSpec(memory_space=pltpu.MemorySpace.SMEM),   # bias
                # Whole packed batch is one block -> stays resident across row tiles.
                pl.BlockSpec((C_IN, H_in, W_in), lambda r: (0, 0, 0)),
            ],
            out_specs=pl.BlockSpec((C_OUT, th_out, W_lane), lambda r: (0, r, 0)),
        ),
        compiler_params=pltpu.CompilerParams(
            dimension_semantics=("parallel",),   # independent row tiles (v7x: 2 TCs)
        ),
    )(w_flat, b, xp)

    # ---- unpack: [C, Ho_pad, W_lane] -> [N, C, Ho, Wo] (drop halo/pad garbage) ----
    out = out_packed[:, :Ho, :N * W].reshape(C_OUT, Ho, N, W)[:, :, :, :Wo]
    return jnp.transpose(out, (2, 0, 1, 3))


def make_params():
    # Same semantics as `self.conv1.weight.copy_(initial_value)`: the 3x3 edge kernel
    # broadcasts over [out_channels, in_channels].
    edge = jnp.array(
        [[-1.0, -1.0, -1.0],
         [-1.0,  8.0, -1.0],
         [-1.0, -1.0, -1.0]], dtype=jnp.float32)
    weight = jnp.broadcast_to(edge, (C_OUT, C_IN, K, K))
    # PyTorch default Conv2d bias init: U(-1/sqrt(fan_in), 1/sqrt(fan_in)), fan_in = 27.
    # Deterministic stand-in; exact values differ from torch's RNG.
    # TODO(synk): export the bias from the PyTorch module if bit/value parity is required.
    bound = 1.0 / jnp.sqrt(jnp.float32(C_IN * K * K))
    bias = jax.random.uniform(
        jax.random.PRNGKey(0), (C_OUT,), jnp.float32, minval=-bound, maxval=bound)
    return weight, bias


if __name__ == "__main__":
    key = jax.random.PRNGKey(0)
    x = jax.random.normal(key, (2, 3, 16, 16), dtype=jnp.float32)

    weight, bias = make_params()

    out = conv2d_3x3(x, weight, bias)
    out = jax.block_until_ready(out)

    # Reference check with XLA's conv (NCHW, OIHW, valid padding).
    ref = jax.lax.conv_general_dilated(
        x, weight, window_strides=(1, 1), padding="VALID",
        dimension_numbers=("NCHW", "OIHW", "NCHW"),
    ) + bias.reshape(1, C_OUT, 1, 1)
    assert out.shape == (2, 3, 14, 14)
    assert jnp.allclose(out, ref, atol=1e-4, rtol=1e-4)

    print("KERNEL_OK")
</pallas_src>

<mosaic_0001>
module attributes {stable_mosaic.version = 11 : i64} {
  func.func @conv3x3_kernel(%arg0: i32, %arg1: memref<81xf32, #tpu.memory_space<smem>>, %arg2: memref<3xf32, #tpu.memory_space<smem>>, %arg3: memref<3x18x130xf32, #tpu.memory_space<vmem>>, %arg4: memref<3x8x128xf32, #tpu.memory_space<vmem>>) attributes {dimension_semantics = [#tpu.dimension_semantics<parallel>], iteration_bounds = array<i64: 2>, scalar_prefetch = 0 : i64, scratch_operands = 0 : i64, tpu.core_type = #tpu.core_type<tc>, window_params = [{transform_indices = @transform_0, window_bounds = array<i64: 81>}, {transform_indices = @transform_1, window_bounds = array<i64: 3>}, {pipeline_mode = #tpu.pipeline_mode<synchronous>, transform_indices = @transform_2, window_bounds = array<i64: 3, 18, 130>}, {transform_indices = @transform_3, window_bounds = array<i64: 3, 8, 128>}]} {
    %c8_i32 = arith.constant 8 : i32
    %0 = arith.muli %arg0, %c8_i32 : i32
    %1 = tpu.assume_multiple %0, 8 : i32
    %c0 = arith.constant 0 : index
    %2 = memref.load %arg2[%c0] : memref<3xf32, #tpu.memory_space<smem>>
    %3 = vector.broadcast %2 : f32 to vector<8x128xf32>
    %cst = arith.constant 0.000000e+00 : f32
    %4 = vector.broadcast %cst : f32 to vector<8x128xf32>
    %cst_0 = arith.constant 0.000000e+00 : f32
    %5 = vector.broadcast %cst_0 : f32 to vector<8x128xf32>
    %c1 = arith.constant 1 : index
    %6 = memref.load %arg2[%c1] : memref<3xf32, #tpu.memory_space<smem>>
    %7 = vector.broadcast %6 : f32 to vector<8x128xf32>
    %cst_1 = arith.constant 0.000000e+00 : f32
    %8 = vector.broadcast %cst_1 : f32 to vector<8x128xf32>
    %cst_2 = arith.constant 0.000000e+00 : f32
    %9 = vector.broadcast %cst_2 : f32 to vector<8x128xf32>
    %c2 = arith.constant 2 : index
    %10 = memref.load %arg2[%c2] : memref<3xf32, #tpu.memory_space<smem>>
    %11 = vector.broadcast %10 : f32 to vector<8x128xf32>
    %cst_3 = arith.constant 0.000000e+00 : f32
    %12 = vector.broadcast %cst_3 : f32 to vector<8x128xf32>
    %cst_4 = arith.constant 0.000000e+00 : f32
    %13 = vector.broadcast %cst_4 : f32 to vector<8x128xf32>
    %c0_5 = arith.constant 0 : index
    %14 = arith.index_cast %1 : i32 to index
    %c0_6 = arith.constant 0 : index
    %15 = vector.load %arg3[%c0_5, %14, %c0_6] : memref<3x18x130xf32, #tpu.memory_space<vmem>>, vector<1x10x130xf32>
    %16 = vector.shape_cast %15 : vector<1x10x130xf32> to vector<10x130xf32>
    %17 = vector.extract_strided_slice %16 {offsets = [0, 0], sizes = [8, 128], strides = [1, 1]} : vector<10x130xf32> to vector<8x128xf32>
    %c0_7 = arith.constant 0 : index
    %18 = memref.load %arg1[%c0_7] : memref<81xf32, #tpu.memory_space<smem>>
    %19 = vector.broadcast %18 : f32 to vector<8x128xf32>
    %20 = arith.mulf %19, %17 : vector<8x128xf32>
    %21 = arith.addf %3, %20 : vector<8x128xf32>
    %c27 = arith.constant 27 : index
    %22 = memref.load %arg1[%c27] : memref<81xf32, #tpu.memory_space<smem>>
    %23 = vector.broadcast %22 : f32 to vector<8x128xf32>
    %24 = arith.mulf %23, %17 : vector<8x128xf32>
    %25 = arith.addf %7, %24 : vector<8x128xf32>
    %c54 = arith.constant 54 : index
    %26 = memref.load %arg1[%c54] : memref<81xf32, #tpu.memory_space<smem>>
    %27 = vector.broadcast %26 : f32 to vector<8x128xf32>
    %28 = arith.mulf %27, %17 : vector<8x128xf32>
    %29 = arith.addf %11, %28 : vector<8x128xf32>
    %30 = vector.extract_strided_slice %16 {offsets = [0, 1], sizes = [8, 128], strides = [1, 1]} : vector<10x130xf32> to vector<8x128xf32>
    %c1_8 = arith.constant 1 : index
    %31 = memref.load %arg1[%c1_8] : memref<81xf32, #tpu.memory_space<smem>>
    %32 = vector.broadcast %31 : f32 to vector<8x128xf32>
    %33 = arith.mulf %32, %30 : vector<8x128xf32>
    %34 = arith.addf %21, %33 : vector<8x128xf32>
    %c28 = arith.constant 28 : index
    %35 = memref.load %arg1[%c28] : memref<81xf32, #tpu.memory_space<smem>>
    %36 = vector.broadcast %35 : f32 to vector<8x128xf32>
    %37 = arith.mulf %36, %30 : vector<8x128xf32>
    %38 = arith.addf %25, %37 : vector<8x128xf32>
    %c55 = arith.constant 55 : index
    %39 = memref.load %arg1[%c55] : memref<81xf32, #tpu.memory_space<smem>>
    %40 = vector.broadcast %39 : f32 to vector<8x128xf32>
    %41 = arith.mulf %40, %30 : vector<8x128xf32>
    %42 = arith.addf %29, %41 : vector<8x128xf32>
    %43 = vector.extract_strided_slice %16 {offsets = [0, 2], sizes = [8, 128], strides = [1, 1]} : vector<10x130xf32> to vector<8x128xf32>
    %c2_9 = arith.constant 2 : index
    %44 = memref.load %arg1[%c2_9] : memref<81xf32, #tpu.memory_space<smem>>
    %45 = vector.broadcast %44 : f32 to vector<8x128xf32>
    %46 = arith.mulf %45, %43 : vector<8x128xf32>
    %47 = arith.addf %34, %46 : vector<8x128xf32>
    %c29 = arith.constant 29 : index
    %48 = memref.load %arg1[%c29] : memref<81xf32, #tpu.memory_space<smem>>
    %49 = vector.broadcast %48 : f32 to vector<8x128xf32>
    %50 = arith.mulf %49, %43 : vector<8x128xf32>
    %51 = arith.addf %38, %50 : vector<8x128xf32>
    %c56 = arith.constant 56 : index
    %52 = memref.load %arg1[%c56] : memref<81xf32, #tpu.memory_space<smem>>
    %53 = vector.broadcast %52 : f32 to vector<8x128xf32>
    %54 = arith.mulf %53, %43 : vector<8x128xf32>
    %55 = arith.addf %42, %54 : vector<8x128xf32>
    %56 = vector.extract_strided_slice %16 {offsets = [1, 0], sizes = [8, 128], strides = [1, 1]} : vector<10x130xf32> to vector<8x128xf32>
    %c3 = arith.constant 3 : index
    %57 = memref.load %arg1[%c3] : memref<81xf32, #tpu.memory_space<smem>>
    %58 = vector.broadcast %57 : f32 to vector<8x128xf32>
    %59 = arith.mulf %58, %56 : vector<8x128xf32>
    %60 = arith.addf %47, %59 : vector<8x128xf32>
    %c30 = arith.constant 30 : index
    %61 = memref.load %arg1[%c30] : memref<81xf32, #tpu.memory_space<smem>>
    %62 = vector.broadcast %61 : f32 to vector<8x128xf32>
    %63 = arith.mulf %62, %56 : vector<8x128xf32>
    %64 = arith.addf %51, %63 : vector<8x128xf32>
    %c57 = arith.constant 57 : index
    %65 = memref.load %arg1[%c57] : memref<81xf32, #tpu.memory_space<smem>>
    %66 = vector.broadcast %65 : f32 to vector<8x128xf32>
    %67 = arith.mulf %66, %56 : vector<8x128xf32>
    %68 = arith.addf %55, %67 : vector<8x128xf32>
    %69 = vector.extract_strided_slice %16 {offsets = [1, 1], sizes = [8, 128], strides = [1, 1]} : vector<10x130xf32> to vector<8x128xf32>
    %c4 = arith.constant 4 : index
    %70 = memref.load %arg1[%c4] : memref<81xf32, #tpu.memory_space<smem>>
    %71 = vector.broadcast %70 : f32 to vector<8x128xf32>
    %72 = arith.mulf %71, %69 : vector<8x128xf32>
    %73 = arith.addf %60, %72 : vector<8x128xf32>
    %c31 = arith.constant 31 : index
    %74 = memref.load %arg1[%c31] : memref<81xf32, #tpu.memory_space<smem>>
    %75 = vector.broadcast %74 : f32 to vector<8x128xf32>
    %76 = arith.mulf %75, %69 : vector<8x128xf32>
    %77 = arith.addf %64, %76 : vector<8x128xf32>
    %c58 = arith.constant 58 : index
    %78 = memref.load %arg1[%c58] : memref<81xf32, #tpu.memory_space<smem>>
    %79 = vector.broadcast %78 : f32 to vector<8x128xf32>
    %80 = arith.mulf %79, %69 : vector<8x128xf32>
    %81 = arith.addf %68, %80 : vector<8x128xf32>
    %82 = vector.extract_strided_slice %16 {offsets = [1, 2], sizes = [8, 128], strides = [1, 1]} : vector<10x130xf32> to vector<8x128xf32>
    %c5 = arith.constant 5 : index
    %83 = memref.load %arg1[%c5] : memref<81xf32, #tpu.memory_space<smem>>
    %84 = vector.broadcast %83 : f32 to vector<8x128xf32>
    %85 = arith.mulf %84, %82 : vector<8x128xf32>
    %86 = arith.addf %73, %85 : vector<8x128xf32>
    %c32 = arith.constant 32 : index
    %87 = memref.load %arg1[%c32] : memref<81xf32, #tpu.memory_space<smem>>
    %88 = vector.broadcast %87 : f32 to vector<8x128xf32>
    %89 = arith.mulf %88, %82 : vector<8x128xf32>
    %90 = arith.addf %77, %89 : vector<8x128xf32>
    %c59 = arith.constant 59 : index
    %91 = memref.load %arg1[%c59] : memref<81xf32, #tpu.memory_space<smem>>
    %92 = vector.broadcast %91 : f32 to vector<8x128xf32>
    %93 = arith.mulf %92, %82 : vector<8x128xf32>
    %94 = arith.addf %81, %93 : vector<8x128xf32>
    %95 = vector.extract_strided_slice %16 {offsets = [2, 0], sizes = [8, 128], strides = [1, 1]} : vector<10x130xf32> to vector<8x128xf32>
    %c6 = arith.constant 6 : index
    %96 = memref.load %arg1[%c6] : memref<81xf32, #tpu.memory_space<smem>>
    %97 = vector.broadcast %96 : f32 to vector<8x128xf32>
    %98 = arith.mulf %97, %95 : vector<8x128xf32>
    %99 = arith.addf %86, %98 : vector<8x128xf32>
    %c33 = arith.constant 33 : index
    %100 = memref.load %arg1[%c33] : memref<81xf32, #tpu.memory_space<smem>>
    %101 = vector.broadcast %100 : f32 to vector<8x128xf32>
    %102 = arith.mulf %101, %95 : vector<8x128xf32>
    %103 = arith.addf %90, %102 : vector<8x128xf32>
    %c60 = arith.constant 60 : index
    %104 = memref.load %arg1[%c60] : memref<81xf32, #tpu.memory_space<smem>>
    %105 = vector.broadcast %104 : f32 to vector<8x128xf32>
    %106 = arith.mulf %105, %95 : vector<8x128xf32>
    %107 = arith.addf %94, %106 : vector<8x128xf32>
    %108 = vector.extract_strided_slice %16 {offsets = [2, 1], sizes = [8, 128], strides = [1, 1]} : vector<10x130xf32> to vector<8x128xf32>
    %c7 = arith.constant 7 : index
    %109 = memref.load %arg1[%c7] : memref<81xf32, #tpu.memory_space<smem>>
    %110 = vector.broadcast %109 : f32 to vector<8x128xf32>
    %111 = arith.mulf %110, %108 : vector<8x128xf32>
    %112 = arith.addf %99, %111 : vector<8x128xf32>
    %c34 = arith.constant 34 : index
    %113 = memref.load %arg1[%c34] : memref<81xf32, #tpu.memory_space<smem>>
    %114 = vector.broadcast %113 : f32 to vector<8x128xf32>
    %115 = arith.mulf %114, %108 : vector<8x128xf32>
    %116 = arith.addf %103, %115 : vector<8x128xf32>
    %c61 = arith.constant 61 : index
    %117 = memref.load %arg1[%c61] : memref<81xf32, #tpu.memory_space<smem>>
    %118 = vector.broadcast %117 : f32 to vector<8x128xf32>
    %119 = arith.mulf %118, %108 : vector<8x128xf32>
    %120 = arith.addf %107, %119 : vector<8x128xf32>
    %121 = vector.extract_strided_slice %16 {offsets = [2, 2], sizes = [8, 128], strides = [1, 1]} : vector<10x130xf32> to vector<8x128xf32>
    %c8 = arith.constant 8 : index
    %122 = memref.load %arg1[%c8] : memref<81xf32, #tpu.memory_space<smem>>
    %123 = vector.broadcast %122 : f32 to vector<8x128xf32>
    %124 = arith.mulf %123, %121 : vector<8x128xf32>
    %125 = arith.addf %112, %124 : vector<8x128xf32>
    %c35 = arith.constant 35 : index
    %126 = memref.load %arg1[%c35] : memref<81xf32, #tpu.memory_space<smem>>
    %127 = vector.broadcast %126 : f32 to vector<8x128xf32>
    %128 = arith.mulf %127, %121 : vector<8x128xf32>
    %129 = arith.addf %116, %128 : vector<8x128xf32>
    %c62 = arith.constant 62 : index
    %130 = memref.load %arg1[%c62] : memref<81xf32, #tpu.memory_space<smem>>
    %131 = vector.broadcast %130 : f32 to vector<8x128xf32>
    %132 = arith.mulf %131, %121 : vector<8x128xf32>
    %133 = arith.addf %120, %132 : vector<8x128xf32>
    %c1_10 = arith.constant 1 : index
    %134 = arith.index_cast %1 : i32 to index
    %c0_11 = arith.constant 0 : index
    %135 = vector.load %arg3[%c1_10, %134, %c0_11] : memref<3x18x130xf32, #tpu.memory_space<vmem>>, vector<1x10x130xf32>
    %136 = vector.shape_cast %135 : vector<1x10x130xf32> to vector<10x130xf32>
    %137 = vector.extract_strided_slice %136 {offsets = [0, 0], sizes = [8, 128], strides = [1, 1]} : vector<10x130xf32> to vector<8x128xf32>
    %c9 = arith.constant 9 : index
    %138 = memref.load %arg1[%c9] : memref<81xf32, #tpu.memory_space<smem>>
    %139 = vector.broadcast %138 : f32 to vector<8x128xf32>
    %140 = arith.mulf %139, %137 : vector<8x128xf32>
    %141 = arith.addf %4, %140 : vector<8x128xf32>
    %c36 = arith.constant 36 : index
    %142 = memref.load %arg1[%c36] : memref<81xf32, #tpu.memory_space<smem>>
    %143 = vector.broadcast %142 : f32 to vector<8x128xf32>
    %144 = arith.mulf %143, %137 : vector<8x128xf32>
    %145 = arith.addf %8, %144 : vector<8x128xf32>
    %c63 = arith.constant 63 : index
    %146 = memref.load %arg1[%c63] : memref<81xf32, #tpu.memory_space<smem>>
    %147 = vector.broadcast %146 : f32 to vector<8x128xf32>
    %148 = arith.mulf %147, %137 : vector<8x128xf32>
    %149 = arith.addf %12, %148 : vector<8x128xf32>
    %150 = vector.extract_strided_slice %136 {offsets = [0, 1], sizes = [8, 128], strides = [1, 1]} : vector<10x130xf32> to vector<8x128xf32>
    %c10 = arith.constant 10 : index
    %151 = memref.load %arg1[%c10] : memref<81xf32, #tpu.memory_space<smem>>
    %152 = vector.broadcast %151 : f32 to vector<8x128xf32>
    %153 = arith.mulf %152, %150 : vector<8x128xf32>
    %154 = arith.addf %141, %153 : vector<8x128xf32>
    %c37 = arith.constant 37 : index
    %155 = memref.load %arg1[%c37] : memref<81xf32, #tpu.memory_space<smem>>
    %156 = vector.broadcast %155 : f32 to vector<8x128xf32>
    %157 = arith.mulf %156, %150 : vector<8x128xf32>
    %158 = arith.addf %145, %157 : vector<8x128xf32>
    %c64 = arith.constant 64 : index
    %159 = memref.load %arg1[%c64] : memref<81xf32, #tpu.memory_space<smem>>
    %160 = vector.broadcast %159 : f32 to vector<8x128xf32>
    %161 = arith.mulf %160, %150 : vector<8x128xf32>
    %162 = arith.addf %149, %161 : vector<8x128xf32>
    %163 = vector.extract_strided_slice %136 {offsets = [0, 2], sizes = [8, 128], strides = [1, 1]} : vector<10x130xf32> to vector<8x128xf32>
    %c11 = arith.constant 11 : index
    %164 = memref.load %arg1[%c11] : memref<81xf32, #tpu.memory_space<smem>>
    %165 = vector.broadcast %164 : f32 to vector<8x128xf32>
    %166 = arith.mulf %165, %163 : vector<8x128xf32>
    %167 = arith.addf %154, %166 : vector<8x128xf32>
    %c38 = arith.constant 38 : index
    %168 = memref.load %arg1[%c38] : memref<81xf32, #tpu.memory_space<smem>>
    %169 = vector.broadcast %168 : f32 to vector<8x128xf32>
    %170 = arith.mulf %169, %163 : vector<8x128xf32>
    %171 = arith.addf %158, %170 : vector<8x128xf32>
    %c65 = arith.constant 65 : index
    %172 = memref.load %arg1[%c65] : memref<81xf32, #tpu.memory_space<smem>>
    %173 = vector.broadcast %172 : f32 to vector<8x128xf32>
    %174 = arith.mulf %173, %163 : vector<8x128xf32>
    %175 = arith.addf %162, %174 : vector<8x128xf32>
    %176 = vector.extract_strided_slice %136 {offsets = [1, 0], sizes = [8, 128], strides = [1, 1]} : vector<10x130xf32> to vector<8x128xf32>
    %c12 = arith.constant 12 : index
    %177 = memref.load %arg1[%c12] : memref<81xf32, #tpu.memory_space<smem>>
    %178 = vector.broadcast %177 : f32 to vector<8x128xf32>
    %179 = arith.mulf %178, %176 : vector<8x128xf32>
    %180 = arith.addf %167, %179 : vector<8x128xf32>
    %c39 = arith.constant 39 : index
    %181 = memref.load %arg1[%c39] : memref<81xf32, #tpu.memory_space<smem>>
    %182 = vector.broadcast %181 : f32 to vector<8x128xf32>
    %183 = arith.mulf %182, %176 : vector<8x128xf32>
    %184 = arith.addf %171, %183 : vector<8x128xf32>
    %c66 = arith.constant 66 : index
    %185 = memref.load %arg1[%c66] : memref<81xf32, #tpu.memory_space<smem>>
    %186 = vector.broadcast %185 : f32 to vector<8x128xf32>
    %187 = arith.mulf %186, %176 : vector<8x128xf32>
    %188 = arith.addf %175, %187 : vector<8x128xf32>
    %189 = vector.extract_strided_slice %136 {offsets = [1, 1], sizes = [8, 128], strides = [1, 1]} : vector<10x130xf32> to vector<8x128xf32>
    %c13 = arith.constant 13 : index
    %190 = memref.load %arg1[%c13] : memref<81xf32, #tpu.memory_space<smem>>
    %191 = vector.broadcast %190 : f32 to vector<8x128xf32>
    %192 = arith.mulf %191, %189 : vector<8x128xf32>
    %193 = arith.addf %180, %192 : vector<8x128xf32>
    %c40 = arith.constant 40 : index
    %194 = memref.load %arg1[%c40] : memref<81xf32, #tpu.memory_space<smem>>
    %195 = vector.broadcast %194 : f32 to vector<8x128xf32>
    %196 = arith.mulf %195, %189 : vector<8x128xf32>
    %197 = arith.addf %184, %196 : vector<8x128xf32>
    %c67 = arith.constant 67 : index
    %198 = memref.load %arg1[%c67] : memref<81xf32, #tpu.memory_space<smem>>
    %199 = vector.broadcast %198 : f32 to vector<8x128xf32>
    %200 = arith.mulf %199, %189 : vector<8x128xf32>
    %201 = arith.addf %188, %200 : vector<8x128xf32>
    %202 = vector.extract_strided_slice %136 {offsets = [1, 2], sizes = [8, 128], strides = [1, 1]} : vector<10x130xf32> to vector<8x128xf32>
    %c14 = arith.constant 14 : index
    %203 = memref.load %arg1[%c14] : memref<81xf32, #tpu.memory_space<smem>>
    %204 = vector.broadcast %203 : f32 to vector<8x128xf32>
    %205 = arith.mulf %204, %202 : vector<8x128xf32>
    %206 = arith.addf %193, %205 : vector<8x128xf32>
    %c41 = arith.constant 41 : index
    %207 = memref.load %arg1[%c41] : memref<81xf32, #tpu.memory_space<smem>>
    %208 = vector.broadcast %207 : f32 to vector<8x128xf32>
    %209 = arith.mulf %208, %202 : vector<8x128xf32>
    %210 = arith.addf %197, %209 : vector<8x128xf32>
    %c68 = arith.constant 68 : index
    %211 = memref.load %arg1[%c68] : memref<81xf32, #tpu.memory_space<smem>>
    %212 = vector.broadcast %211 : f32 to vector<8x128xf32>
    %213 = arith.mulf %212, %202 : vector<8x128xf32>
    %214 = arith.addf %201, %213 : vector<8x128xf32>
    %215 = vector.extract_strided_slice %136 {offsets = [2, 0], sizes = [8, 128], strides = [1, 1]} : vector<10x130xf32> to vector<8x128xf32>
    %c15 = arith.constant 15 : index
    %216 = memref.load %arg1[%c15] : memref<81xf32, #tpu.memory_space<smem>>
    %217 = vector.broadcast %216 : f32 to vector<8x128xf32>
    %218 = arith.mulf %217, %215 : vector<8x128xf32>
    %219 = arith.addf %206, %218 : vector<8x128xf32>
    %c42 = arith.constant 42 : index
    %220 = memref.load %arg1[%c42] : memref<81xf32, #tpu.memory_space<smem>>
    %221 = vector.broadcast %220 : f32 to vector<8x128xf32>
    %222 = arith.mulf %221, %215 : vector<8x128xf32>
    %223 = arith.addf %210, %222 : vector<8x128xf32>
    %c69 = arith.constant 69 : index
    %224 = memref.load %arg1[%c69] : memref<81xf32, #tpu.memory_space<smem>>
    %225 = vector.broadcast %224 : f32 to vector<8x128xf32>
    %226 = arith.mulf %225, %215 : vector<8x128xf32>
    %227 = arith.addf %214, %226 : vector<8x128xf32>
    %228 = vector.extract_strided_slice %136 {offsets = [2, 1], sizes = [8, 128], strides = [1, 1]} : vector<10x130xf32> to vector<8x128xf32>
    %c16 = arith.constant 16 : index
    %229 = memref.load %arg1[%c16] : memref<81xf32, #tpu.memory_space<smem>>
    %230 = vector.broadcast %229 : f32 to vector<8x128xf32>
    %231 = arith.mulf %230, %228 : vector<8x128xf32>
    %232 = arith.addf %219, %231 : vector<8x128xf32>
    %c43 = arith.constant 43 : index
    %233 = memref.load %arg1[%c43] : memref<81xf32, #tpu.memory_space<smem>>
    %234 = vector.broadcast %233 : f32 to vector<8x128xf32>
    %235 = arith.mulf %234, %228 : vector<8x128xf32>
    %236 = arith.addf %223, %235 : vector<8x128xf32>
    %c70 = arith.constant 70 : index
    %237 = memref.load %arg1[%c70] : memref<81xf32, #tpu.memory_space<smem>>
    %238 = vector.broadcast %237 : f32 to vector<8x128xf32>
    %239 = arith.mulf %238, %228 : vector<8x128xf32>
    %240 = arith.addf %227, %239 : vector<8x128xf32>
    %241 = vector.extract_strided_slice %136 {offsets = [2, 2], sizes = [8, 128], strides = [1, 1]} : vector<10x130xf32> to vector<8x128xf32>
    %c17 = arith.constant 17 : index
    %242 = memref.load %arg1[%c17] : memref<81xf32, #tpu.memory_space<smem>>
    %243 = vector.broadcast %242 : f32 to vector<8x128xf32>
    %244 = arith.mulf %243, %241 : vector<8x128xf32>
    %245 = arith.addf %232, %244 : vector<8x128xf32>
    %c44 = arith.constant 44 : index
    %246 = memref.load %arg1[%c44] : memref<81xf32, #tpu.memory_space<smem>>
    %247 = vector.broadcast %246 : f32 to vector<8x128xf32>
    %248 = arith.mulf %247, %241 : vector<8x128xf32>
    %249 = arith.addf %236, %248 : vector<8x128xf32>
    %c71 = arith.constant 71 : index
    %250 = memref.load %arg1[%c71] : memref<81xf32, #tpu.memory_space<smem>>
    %251 = vector.broadcast %250 : f32 to vector<8x128xf32>
    %252 = arith.mulf %251, %241 : vector<8x128xf32>
    %253 = arith.addf %240, %252 : vector<8x128xf32>
    %c2_12 = arith.constant 2 : index
    %254 = arith.index_cast %1 : i32 to index
    %c0_13 = arith.constant 0 : index
    %255 = vector.load %arg3[%c2_12, %254, %c0_13] : memref<3x18x130xf32, #tpu.memory_space<vmem>>, vector<1x10x130xf32>
    %256 = vector.shape_cast %255 : vector<1x10x130xf32> to vector<10x130xf32>
    %257 = vector.extract_strided_slice %256 {offsets = [0, 0], sizes = [8, 128], strides = [1, 1]} : vector<10x130xf32> to vector<8x128xf32>
    %c18 = arith.constant 18 : index
    %258 = memref.load %arg1[%c18] : memref<81xf32, #tpu.memory_space<smem>>
    %259 = vector.broadcast %258 : f32 to vector<8x128xf32>
    %260 = arith.mulf %259, %257 : vector<8x128xf32>
    %261 = arith.addf %5, %260 : vector<8x128xf32>
    %c45 = arith.constant 45 : index
    %262 = memref.load %arg1[%c45] : memref<81xf32, #tpu.memory_space<smem>>
    %263 = vector.broadcast %262 : f32 to vector<8x128xf32>
    %264 = arith.mulf %263, %257 : vector<8x128xf32>
    %265 = arith.addf %9, %264 : vector<8x128xf32>
    %c72 = arith.constant 72 : index
    %266 = memref.load %arg1[%c72] : memref<81xf32, #tpu.memory_space<smem>>
    %267 = vector.broadcast %266 : f32 to vector<8x128xf32>
    %268 = arith.mulf %267, %257 : vector<8x128xf32>
    %269 = arith.addf %13, %268 : vector<8x128xf32>
    %270 = vector.extract_strided_slice %256 {offsets = [0, 1], sizes = [8, 128], strides = [1, 1]} : vector<10x130xf32> to vector<8x128xf32>
    %c19 = arith.constant 19 : index
    %271 = memref.load %arg1[%c19] : memref<81xf32, #tpu.memory_space<smem>>
    %272 = vector.broadcast %271 : f32 to vector<8x128xf32>
    %273 = arith.mulf %272, %270 : vector<8x128xf32>
    %274 = arith.addf %261, %273 : vector<8x128xf32>
    %c46 = arith.constant 46 : index
    %275 = memref.load %arg1[%c46] : memref<81xf32, #tpu.memory_space<smem>>
    %276 = vector.broadcast %275 : f32 to vector<8x128xf32>
    %277 = arith.mulf %276, %270 : vector<8x128xf32>
    %278 = arith.addf %265, %277 : vector<8x128xf32>
    %c73 = arith.constant 73 : index
    %279 = memref.load %arg1[%c73] : memref<81xf32, #tpu.memory_space<smem>>
    %280 = vector.broadcast %279 : f32 to vector<8x128xf32>
    %281 = arith.mulf %280, %270 : vector<8x128xf32>
    %282 = arith.addf %269, %281 : vector<8x128xf32>
    %283 = vector.extract_strided_slice %256 {offsets = [0, 2], sizes = [8, 128], strides = [1, 1]} : vector<10x130xf32> to vector<8x128xf32>
    %c20 = arith.constant 20 : index
    %284 = memref.load %arg1[%c20] : memref<81xf32, #tpu.memory_space<smem>>
    %285 = vector.broadcast %284 : f32 to vector<8x128xf32>
    %286 = arith.mulf %285, %283 : vector<8x128xf32>
    %287 = arith.addf %274, %286 : vector<8x128xf32>
    %c47 = arith.constant 47 : index
    %288 = memref.load %arg1[%c47] : memref<81xf32, #tpu.memory_space<smem>>
    %289 = vector.broadcast %288 : f32 to vector<8x128xf32>
    %290 = arith.mulf %289, %283 : vector<8x128xf32>
    %291 = arith.addf %278, %290 : vector<8x128xf32>
    %c74 = arith.constant 74 : index
    %292 = memref.load %arg1[%c74] : memref<81xf32, #tpu.memory_space<smem>>
    %293 = vector.broadcast %292 : f32 to vector<8x128xf32>
    %294 = arith.mulf %293, %283 : vector<8x128xf32>
    %295 = arith.addf %282, %294 : vector<8x128xf32>
    %296 = vector.extract_strided_slice %256 {offsets = [1, 0], sizes = [8, 128], strides = [1, 1]} : vector<10x130xf32> to vector<8x128xf32>
    %c21 = arith.constant 21 : index
    %297 = memref.load %arg1[%c21] : memref<81xf32, #tpu.memory_space<smem>>
    %298 = vector.broadcast %297 : f32 to vector<8x128xf32>
    %299 = arith.mulf %298, %296 : vector<8x128xf32>
    %300 = arith.addf %287, %299 : vector<8x128xf32>
    %c48 = arith.constant 48 : index
    %301 = memref.load %arg1[%c48] : memref<81xf32, #tpu.memory_space<smem>>
    %302 = vector.broadcast %301 : f32 to vector<8x128xf32>
    %303 = arith.mulf %302, %296 : vector<8x128xf32>
    %304 = arith.addf %291, %303 : vector<8x128xf32>
    %c75 = arith.constant 75 : index
    %305 = memref.load %arg1[%c75] : memref<81xf32, #tpu.memory_space<smem>>
    %306 = vector.broadcast %305 : f32 to vector<8x128xf32>
    %307 = arith.mulf %306, %296 : vector<8x128xf32>
    %308 = arith.addf %295, %307 : vector<8x128xf32>
    %309 = vector.extract_strided_slice %256 {offsets = [1, 1], sizes = [8, 128], strides = [1, 1]} : vector<10x130xf32> to vector<8x128xf32>
    %c22 = arith.constant 22 : index
    %310 = memref.load %arg1[%c22] : memref<81xf32, #tpu.memory_space<smem>>
    %311 = vector.broadcast %310 : f32 to vector<8x128xf32>
    %312 = arith.mulf %311, %309 : vector<8x128xf32>
    %313 = arith.addf %300, %312 : vector<8x128xf32>
    %c49 = arith.constant 49 : index
    %314 = memref.load %arg1[%c49] : memref<81xf32, #tpu.memory_space<smem>>
    %315 = vector.broadcast %314 : f32 to vector<8x128xf32>
    %316 = arith.mulf %315, %309 : vector<8x128xf32>
    %317 = arith.addf %304, %316 : vector<8x128xf32>
    %c76 = arith.constant 76 : index
    %318 = memref.load %arg1[%c76] : memref<81xf32, #tpu.memory_space<smem>>
    %319 = vector.broadcast %318 : f32 to vector<8x128xf32>
    %320 = arith.mulf %319, %309 : vector<8x128xf32>
    %321 = arith.addf %308, %320 : vector<8x128xf32>
    %322 = vector.extract_strided_slice %256 {offsets = [1, 2], sizes = [8, 128], strides = [1, 1]} : vector<10x130xf32> to vector<8x128xf32>
    %c23 = arith.constant 23 : index
    %323 = memref.load %arg1[%c23] : memref<81xf32, #tpu.memory_space<smem>>
    %324 = vector.broadcast %323 : f32 to vector<8x128xf32>
    %325 = arith.mulf %324, %322 : vector<8x128xf32>
    %326 = arith.addf %313, %325 : vector<8x128xf32>
    %c50 = arith.constant 50 : index
    %327 = memref.load %arg1[%c50] : memref<81xf32, #tpu.memory_space<smem>>
    %328 = vector.broadcast %327 : f32 to vector<8x128xf32>
    %329 = arith.mulf %328, %322 : vector<8x128xf32>
    %330 = arith.addf %317, %329 : vector<8x128xf32>
    %c77 = arith.constant 77 : index
    %331 = memref.load %arg1[%c77] : memref<81xf32, #tpu.memory_space<smem>>
    %332 = vector.broadcast %331 : f32 to vector<8x128xf32>
    %333 = arith.mulf %332, %322 : vector<8x128xf32>
    %334 = arith.addf %321, %333 : vector<8x128xf32>
    %335 = vector.extract_strided_slice %256 {offsets = [2, 0], sizes = [8, 128], strides = [1, 1]} : vector<10x130xf32> to vector<8x128xf32>
    %c24 = arith.constant 24 : index
    %336 = memref.load %arg1[%c24] : memref<81xf32, #tpu.memory_space<smem>>
    %337 = vector.broadcast %336 : f32 to vector<8x128xf32>
    %338 = arith.mulf %337, %335 : vector<8x128xf32>
    %339 = arith.addf %326, %338 : vector<8x128xf32>
    %c51 = arith.constant 51 : index
    %340 = memref.load %arg1[%c51] : memref<81xf32, #tpu.memory_space<smem>>
    %341 = vector.broadcast %340 : f32 to vector<8x128xf32>
    %342 = arith.mulf %341, %335 : vector<8x128xf32>
    %343 = arith.addf %330, %342 : vector<8x128xf32>
    %c78 = arith.constant 78 : index
    %344 = memref.load %arg1[%c78] : memref<81xf32, #tpu.memory_space<smem>>
    %345 = vector.broadcast %344 : f32 to vector<8x128xf32>
    %346 = arith.mulf %345, %335 : vector<8x128xf32>
    %347 = arith.addf %334, %346 : vector<8x128xf32>
    %348 = vector.extract_strided_slice %256 {offsets = [2, 1], sizes = [8, 128], strides = [1, 1]} : vector<10x130xf32> to vector<8x128xf32>
    %c25 = arith.constant 25 : index
    %349 = memref.load %arg1[%c25] : memref<81xf32, #tpu.memory_space<smem>>
    %350 = vector.broadcast %349 : f32 to vector<8x128xf32>
    %351 = arith.mulf %350, %348 : vector<8x128xf32>
    %352 = arith.addf %339, %351 : vector<8x128xf32>
    %c52 = arith.constant 52 : index
    %353 = memref.load %arg1[%c52] : memref<81xf32, #tpu.memory_space<smem>>
    %354 = vector.broadcast %353 : f32 to vector<8x128xf32>
    %355 = arith.mulf %354, %348 : vector<8x128xf32>
    %356 = arith.addf %343, %355 : vector<8x128xf32>
    %c79 = arith.constant 79 : index
    %357 = memref.load %arg1[%c79] : memref<81xf32, #tpu.memory_space<smem>>
    %358 = vector.broadcast %357 : f32 to vector<8x128xf32>
    %359 = arith.mulf %358, %348 : vector<8x128xf32>
    %360 = arith.addf %347, %359 : vector<8x128xf32>
    %361 = vector.extract_strided_slice %256 {offsets = [2, 2], sizes = [8, 128], strides = [1, 1]} : vector<10x130xf32> to vector<8x128xf32>
    %c26 = arith.constant 26 : index
    %362 = memref.load %arg1[%c26] : memref<81xf32, #tpu.memory_space<smem>>
    %363 = vector.broadcast %362 : f32 to vector<8x128xf32>
    %364 = arith.mulf %363, %361 : vector<8x128xf32>
    %365 = arith.addf %352, %364 : vector<8x128xf32>
    %c53 = arith.constant 53 : index
    %366 = memref.load %arg1[%c53] : memref<81xf32, #tpu.memory_space<smem>>
    %367 = vector.broadcast %366 : f32 to vector<8x128xf32>
    %368 = arith.mulf %367, %361 : vector<8x128xf32>
    %369 = arith.addf %356, %368 : vector<8x128xf32>
    %c80 = arith.constant 80 : index
    %370 = memref.load %arg1[%c80] : memref<81xf32, #tpu.memory_space<smem>>
    %371 = vector.broadcast %370 : f32 to vector<8x128xf32>
    %372 = arith.mulf %371, %361 : vector<8x128xf32>
    %373 = arith.addf %360, %372 : vector<8x128xf32>
    %374 = arith.addf %125, %245 : vector<8x128xf32>
    %375 = arith.addf %374, %365 : vector<8x128xf32>
    %c0_14 = arith.constant 0 : index
    %c0_15 = arith.constant 0 : index
    %c0_16 = arith.constant 0 : index
    %376 = vector.load %arg4[%c0_14, %c0_15, %c0_16] : memref<3x8x128xf32, #tpu.memory_space<vmem>>, vector<1x8x128xf32>
    %377 = vector.shape_cast %376 : vector<1x8x128xf32> to vector<8x128xf32>
    %378 = vector.shape_cast %375 : vector<8x128xf32> to vector<1x8x128xf32>
    tpu.vector_store %arg4[%c0_14, %c0_15, %c0_16], %378 {strides = array<i32>} : memref<3x8x128xf32, #tpu.memory_space<vmem>>, vector<1x8x128xf32>,
    %379 = arith.addf %129, %249 : vector<8x128xf32>
    %380 = arith.addf %379, %369 : vector<8x128xf32>
    %c1_17 = arith.constant 1 : index
    %c0_18 = arith.constant 0 : index
    %c0_19 = arith.constant 0 : index
    %381 = vector.load %arg4[%c1_17, %c0_18, %c0_19] : memref<3x8x128xf32, #tpu.memory_space<vmem>>, vector<1x8x128xf32>
    %382 = vector.shape_cast %381 : vector<1x8x128xf32> to vector<8x128xf32>
    %383 = vector.shape_cast %380 : vector<8x128xf32> to vector<1x8x128xf32>
    tpu.vector_store %arg4[%c1_17, %c0_18, %c0_19], %383 {strides = array<i32>} : memref<3x8x128xf32, #tpu.memory_space<vmem>>, vector<1x8x128xf32>,
    %384 = arith.addf %133, %253 : vector<8x128xf32>
    %385 = arith.addf %384, %373 : vector<8x128xf32>
    %c2_20 = arith.constant 2 : index
    %c0_21 = arith.constant 0 : index
    %c0_22 = arith.constant 0 : index
    %386 = vector.load %arg4[%c2_20, %c0_21, %c0_22] : memref<3x8x128xf32, #tpu.memory_space<vmem>>, vector<1x8x128xf32>
    %387 = vector.shape_cast %386 : vector<1x8x128xf32> to vector<8x128xf32>
    %388 = vector.shape_cast %385 : vector<8x128xf32> to vector<1x8x128xf32>
    tpu.vector_store %arg4[%c2_20, %c0_21, %c0_22], %388 {strides = array<i32>} : memref<3x8x128xf32, #tpu.memory_space<vmem>>, vector<1x8x128xf32>,
    return
  }
  func.func @transform_0(%arg0: i32) -> i32 {
    %c0_i32 = arith.constant 0 : i32
    %c0_i32_0 = arith.constant 0 : i32
    return %c0_i32 : i32
  }
  func.func @transform_1(%arg0: i32) -> i32 {
    %c0_i32 = arith.constant 0 : i32
    %c0_i32_0 = arith.constant 0 : i32
    return %c0_i32 : i32
  }
  func.func @transform_2(%arg0: i32) -> (i32, i32, i32) {
    %c0_i32 = arith.constant 0 : i32
    %c0_i32_0 = arith.constant 0 : i32
    %c0_i32_1 = arith.constant 0 : i32
    %c0_i32_2 = arith.constant 0 : i32
    return %c0_i32, %c0_i32_0, %c0_i32_1 : i32, i32, i32
  }
  func.func @transform_3(%arg0: i32) -> (i32, i32, i32) {
    %c0_i32 = arith.constant 0 : i32
    %c0_i32_0 = arith.constant 0 : i32
    %c0_i32_1 = arith.constant 0 : i32
    return %c0_i32, %arg0, %c0_i32_0 : i32, i32, i32
  }
}

</mosaic_0001>

<bundles_post_ra>
// kernel: tpu_custom_call.1
= control target key start
LH: loop header
LB: loop body
LE: loop exit
PB: predicated region body
PF: predicated region fallthrough
CT: control target
= control target key end

     0   :  { %8 = vsyncpa [#allocation5], 0  ;;  %s2922_s0 = inlined_call_operand.hbm [shape: f32[81], index: 0, kind: input, shape index: {}]   ;;  %s2923_s1 = inlined_call_operand.vmem [shape: f32[3], index: 1, kind: input, shape index: {}]   ;;  %s2924_s2 = inlined_call_operand.hbm [shape: f32[3,18,130], index: 2, kind: input, shape index: {}]   ;;  %s2925_s3 = inlined_call_operand.hbm [shape: f32[3,16,128], index: 3, kind: output, shape index: {}]  }
   0x1   :  { %9 = vsyncpa [#allocation6], 0 }
   0x2   :  { %10 = vsyncpa [#allocation3], 0 }
   0x3   :  { %11 = vsyncpa [#allocation4], 0 }
   0x4   :  { %13 = vsyncpa [#allocation4 + $0x1], 0  ;;  %s1993_s12 = smov 0   ;;  %s1995_s13 = smov 0  }
   0x5   :  { %s1997_s14 = smov 0   ;;  %s1999_s15 = smov 0  }
   0x6 LB: > { %s2014_s16 = sadd.s32 4294967295, %s1960_s15   ;;  %s1639_s17 = sadd.s32 4294967294, %s1960_s15   ;;  %s1960_s15 = sphi %s1999_s15, %s2945_s15   ;;  %s1956_s14 = sphi %s1997_s14, %s2944_s14   ;;  %s1952_s13 = sphi %s1995_s13, %s2943_s13   ;;  %s1948_s12 = sphi %s1993_s12, %s2942_s12  }
   0x7   : > { %s2018_s18 = sadd.s32 1, %s1960_s15   ;;  %s89_s19 = sadd.s32 1, %s1956_s14 }
   0x8   : > { %s86_s20 = ssub.s32 %s1960_s15, %s2018_s18  ;;  %p99_p0 = scmp.ne.s32.totalorder %s1956_s14, %s1952_s13 }
   0x9   : > { %p87_p1 = scmp.eq.s32.totalorder %s86_s20, 0  ;;  %p100_p2 = scmp.eq.s32.totalorder %s2014_s16, 1 }
   0xa   : > { %p105_p3 = scmp.ne.s32.totalorder %s1952_s13, %s1948_s12  ;;  %p106_p4 = scmp.eq.s32.totalorder %s1639_s17, 1 }
   0xb   : > { %s2029_s21 = scalar_select %p87_p1, %s1956_s14, %s89_s19  }
   0xc   : > { %p2031_p5 = por %p100_p2, %p99_p0  ;;  %p2035_p6 = por %p106_p4, %p105_p3 }
   0xd   : > { %p1640_p7 = scmp.ge.s32.totalorder %s1960_s15, 1  ;;  %p113_p8 = scmp.lt.s32.totalorder %s1960_s15, 3 }
   0xe   : > { %s2929_s22 = scalar_select %p2031_p5, 1, 0 }
   0xf   : > { %s2930_s23 = scalar_select %p2035_p6, 1, 0 }
  0x10   : > { %p2041_p9 = pnand %p1640_p7, %p113_p8  ;;  %p2926_p10 = scmp.eq.s32.totalorder %s2014_s16, 0 }
  0x11   : > { %s135_s27 = sshll.u32 %s2923_s1, 4  ;;  %s1962_s29 = smov [#allocation8]   ;;  %s136_s27 = int_to_ptr.vmem [resolvable:$true] %s135_s27 }
  0x12   : > { %s2931_s24 = scalar_select %p2041_p9, 1, 0 }
  0x13   : > { %p1768_p11 = pneg %p2041_p9  ;;  %s145_s30 = sshll.u32 %s1962_s29, 4  ;;  %s2057_s30 = int_to_ptr.vmem [resolvable:$true] %s145_s30 }
  0x14   : > { %s1963_s4 = smov [#allocation2]   ;;  %s1847_s7 = scalar_lea.vmem %s136_s27, 16 }
  0x15   : > { %p2053_p12 = pnand %p2926_p10, %p1768_p11  ;;  %p1848_p13 = scmp.ne.s32.totalorder %s136_s27, %s1847_s7 }
  0x16   : > { %p1855_p3 = scmp.lt.s32.totalorder %s136_s27, %s136_s27  ;;  %p1856_p4 = scmp.lt.s32.totalorder %s1847_s7, %s1847_s7 }
  0x17   : > { %1771 = dma.hbm_to_smem (!%p2053_p12), %s2922_s0, 16, %s1963_s4, [#allocation5]  }
  0x18   : > { %p1849_p0 = pneg %p2053_p12  ;;  %p1857_p7 = por %p1856_p4, %p1855_p3 }
  0x1a   : > { %p1850_p1 = pnand %p1849_p0, %p1848_p13 }
  0x1c   : > { %p1851_p2 = pneg %p1850_p1 }
  0x1e   : > { %p1858_p8 = pnand %p1857_p7, %p1851_p2 }
  0x20   : > { %1861 = shalt.err (!%p1858_p8)
}
  0x21   : > { %s1964_s8 = smov [#allocation7]   ;;  %s1873_s9 = scalar_lea.vmem %s2057_s30, 2304 }
  0x22   : > { %1774 = dma.vmem_to_smem (!%p2053_p12), %s136_s27, 16, %s1964_s8, [#allocation6]  }
  0x23   : > { %p1874_p11 = scmp.ne.s32.totalorder %s2057_s30, %s1873_s9  ;;  %p1881_p5 = scmp.lt.s32.totalorder %s2057_s30, %s2057_s30 }
  0x24   : > { %p1882_p13 = scmp.lt.s32.totalorder %s1873_s9, %s1873_s9 }
  0x25   : > { %p1876_p10 = pnand %p1874_p11, %p1849_p0 }
  0x26   : > { %p1883_p1 = por %p1882_p13, %p1881_p5 }
  0x27   : > { %p1877_p6 = pneg %p1876_p10 }
  0x29   : > { %p1884_p9 = pnand %p1883_p1, %p1877_p6 }
  0x2b   : > { %1887 = shalt.err (!%p1884_p9)
}
  0x2c   : > { %s1965_s10 = smov 256   ;;  %s1966_s11 = smov 16  }
  0x2d   : > { %1777 = dma.hbm_to_vmem [thread:$0]  (!%p2053_p12), %s2924_s2, 2304, %s2057_s30, [#allocation3], %s1965_s10, %s1965_s10, %s1966_s11  }
  0x2e   : > { %p2933_p2 = scmp.ne.s32.totalorder %s2931_s24, 0 }
  0x2f   : > { %p2934_p10 = scmp.eq.s32.totalorder (!%p2933_p2), %s2014_s16, 0 }
  0x30   : > { %161 = sbr.rel (%p2933_p2) target bundleno = 420 (0x1a4), region = 32 }
  0x35   : > { %1931 = dma.done.wait (%p2934_p10), [#allocation5], 16   ;;  %p2935_p0 = pmov %p2934_p10 }
  0x37   : > { %1933 = vsyncadd (%p2935_p0), [#allocation5], 4294967280  ;;  %p2936_p5 = pmov %p2935_p0 }
  0x38   : > { %p2937_p6 = pmov %p2935_p0 }
  0x39   : > { %1935 = dma.done.wait (%p2936_p5), [#allocation6], 16  }
  0x3a   : > { %1937 = vsyncadd (%p2937_p6), [#allocation6], 4294967280  ;;  %p2938_p9 = pmov %p2935_p0 }
  0x3b   : > { %p2939_p12 = pmov %p2935_p0 }
  0x3c   : > { %1939 = dma.done.wait (%p2938_p9), [#allocation3], 2304  }
  0x3d   : > { %1941 = vsyncadd (%p2939_p12), [#allocation3], 4294964992 }
  0x3e   : > { %175 = sfence }
  0x3f   : > { %s1648_s20 = sshll.u32 %s2014_s16, 3  ;;  %s1656_s25 = sld [smem:[#allocation2 + $0x1c]]  ;;  %vm303_vm0 = vcmask 1046528   ;;  %vm475_vm1 = vcmask 1045504   ;;  %vm227_vm2 = vcmask 1039360   ;;  %vm267_vm3 = vcmask 1031168  }
  0x40   : > { %s196_s24 = sshra.s32 %s1648_s20, 3  ;;  %s1655_s27 = sld [smem:[#allocation2 + $0x1]] }
  0x41   : > { %s1750_s26 = sshll.u32 %s196_s24, 4  ;;  %s1657_s28 = sld [smem:[#allocation2 + $0x37]] }
  0x42   : > { %s2093_s29 = scalar_lea.vmem [#allocation8], %s1750_s26  ;;  %s1658_s30 = sld [smem:[#allocation2 + $0x2]] }
  0x43   : > { %v2096_v0 = vld [vmem:[%s2093_s29] sm:$0xff]  ;;  %v2099_v1 = vld [vmem:[%s2093_s29 + $0x8] sm:$0xff]  ;;  %s1967_s4 = smov 127   ;;  %s1659_s5 = sld [smem:[#allocation2 + $0x1d]]  ;;  %v2116_v15 = vld [vmem:[%s2093_s29 + $0x18] sm:$0x3] }
  0x44   : > { %s1664_s6 = sld [smem:[#allocation2 + $0x4]]  ;;  %v2119_v17 = vld [vmem:[%s2093_s29 + $0x10] sm:$0x3]  ;;  %s1968_s10 = smov 126  }
  0x45   : > { %v232_v2 = vstv %s1656_s25  ;;  %s1660_s7 = sld [smem:[#allocation2 + $0x38]]  ;;  %p2940_p4 = scmp.ne.s32.totalorder %s2929_s22, 0 }
  0x46   : > { %v233_v3 = vmul.f32 %v232_v2, %v2096_v0  ;;  %v218_v4 = vstv %s1655_s27  ;;  %v234_v6 = vmul.f32 %v232_v2, %v2099_v1  ;;  %s1665_s8 = sld [smem:[#allocation2 + $0x1f]] }
  0x47   : > { %v219_v5 = vmul.f32 %v218_v4, %v2096_v0  ;;  %v220_v7 = vmul.f32 %v218_v4, %v2099_v1  ;;  %v245_v8 = vstv %s1657_s28  ;;  %s1666_s9 = sld [smem:[#allocation2 + $0x3a]] }
  0x48   : > { %237 = vrot.lane.b32.xlu1 %v233_v3, %s1967_s4  ;;  %v247_v9 = vmul.f32 %v245_v8, %v2099_v1  ;;  %v246_v10 = vmul.f32 %v245_v8, %v2096_v0  ;;  %v258_v11 = vstv %s1658_s30  ;;  %s1667_s11 = sld [smem:[#allocation2 + $0x5]] }
  0x49   : > { %223 = vrot.lane.b32.xlu0 %v219_v5, %s1967_s4  ;;  %v260_v12 = vmul.f32 %v258_v11, %v2099_v1  ;;  %v259_v13 = vmul.f32 %v258_v11, %v2096_v0  ;;  %v272_v14 = vstv %s1659_s5  ;;  %s1668_s17 = sld [smem:[#allocation2 + $0x20]] }
  0x4a   : > { %v332_v16 = vstv %s1664_s6  ;;  %v274_v18 = vmul.f32 %v272_v14, %v2099_v1  ;;  %v273_v20 = vmul.f32 %v272_v14, %v2096_v0  ;;  %s1669_s19 = sld [smem:[#allocation2 + $0x3b]] }
  0x4b   : > { %v285_v19 = vstv %s1660_s7  ;;  %v334_v21 = vmul.f32 %v332_v16, %v2099_v1  ;;  %v336_v22 = vmul.f32 %v332_v16, %v2116_v15  ;;  %v333_v24 = vmul.f32 %v332_v16, %v2096_v0  ;;  %s1673_s20 = sld [smem:[#allocation2 + $0x7]] }
  0x4c   : > { %239 = vrot.lane.b32.xlu1 %v234_v6, %s1967_s4  ;;  %v355_v23 = vstv %s1665_s8  ;;  %v335_v25 = vmul.f32 %v332_v16, %v2119_v17  ;;  %v287_v26 = vmul.f32 %v285_v19, %v2099_v1  ;;  %v286_v27 = vmul.f32 %v285_v19, %v2096_v0  ;;  %s1674_s24 = sld [smem:[#allocation2 + $0x22]] }
  0x4d   : > { %225 = vrot.lane.b32.xlu0 %v220_v7, %s1967_s4  ;;  %v357_v28 = vmul.f32 %v355_v23, %v2099_v1  ;;  %v359_v29 = vmul.f32 %v355_v23, %v2116_v15  ;;  %v378_v30 = vstv %s1666_s9  ;;  %v344_v31 = vrot.slane %v334_v21, 1  ;;  %s1675_s25 = sld [smem:[#allocation2 + $0x3d]] }
  0x4e   : > { %v345_v32 = vrot.slane %v336_v22, 1  ;;  %v356_v33 = vmul.f32 %v355_v23, %v2096_v0  ;;  %v358_v34 = vmul.f32 %v355_v23, %v2119_v17  ;;  %v341_v35 = vrot.slane %v333_v24, 1  ;;  %s1676_s26 = sld [smem:[#allocation2 + $0x8]] }
  0x4f   : > { %v342_v36 = vrot.slane %v335_v25, 1  ;;  %v367_v37 = vrot.slane %v357_v28, 1  ;;  %v368_v38 = vrot.slane %v359_v29, 1  ;;  %v380_v39 = vmul.f32 %v378_v30, %v2099_v1  ;;  %s1677_s27 = sld [smem:[#allocation2 + $0x23]] }
  0x50   : > { %252 = vrot.lane.b32.xlu1 %v247_v9, %s1967_s4  ;;  %v382_v40 = vmul.f32 %v378_v30, %v2116_v15  ;;  %v346_v41 = vsel %vm303_vm0, %v344_v31, %v345_v32  ;;  %v364_v42 = vrot.slane %v356_v33, 1  ;;  %v365_v43 = vrot.slane %v358_v34, 1  ;;  %s1678_s28 = sld [smem:[#allocation2 + $0x3e]] }
  0x51   : > { %250 = vrot.lane.b32.xlu0 %v246_v10, %s1967_s4  ;;  %v343_v44 = vsel %vm303_vm0, %v341_v35, %v342_v36  ;;  %v379_v45 = vmul.f32 %v378_v30, %v2096_v0  ;;  %v381_v46 = vmul.f32 %v378_v30, %v2119_v17  ;;  %v401_v47 = vstv %s1667_s11  ;;  %s1688_s30 = sld [smem:[#allocation2 + $0xa]] }
  0x52   : > { %v369_v48 = vsel %vm303_vm0, %v367_v37, %v368_v38  ;;  %v390_v49 = vrot.slane %v380_v39, 1  ;;  %v391_v50 = vrot.slane %v382_v40, 1  ;;  %v366_v51 = vsel %vm303_vm0, %v364_v42, %v365_v43  ;;  %s1689_s5 = sld [smem:[#allocation2 + $0x25]] }
  0x53   : > { %v403_v52 = vmul.f32 %v401_v47, %v2099_v1  ;;  %v405_v53 = vmul.f32 %v401_v47, %v2116_v15  ;;  %v424_v54 = vstv %s1668_s17  ;;  %v387_v55 = vrot.slane %v379_v45, 1  ;;  %s1690_s6 = sld [smem:[#allocation2 + $0x40]] }
  0x54   : > { %265 = vrot.lane.b32.xlu1 %v260_v12, %s1968_s10  ;;  %v388_v56 = vrot.slane %v381_v46, 1  ;;  %v402_v57 = vmul.f32 %v401_v47, %v2096_v0  ;;  %v404_v58 = vmul.f32 %v401_v47, %v2119_v17  ;;  %v392_v59 = vsel %vm303_vm0, %v390_v49, %v391_v50  ;;  %s1691_s7 = sld [smem:[#allocation2 + $0xb]] }
  0x55   : > { %263 = vrot.lane.b32.xlu0 %v259_v13, %s1968_s10  ;;  %v426_v60 = vmul.f32 %v424_v54, %v2099_v1  ;;  %v447_v61 = vstv %s1669_s19  ;;  %v413_v62 = vrot.slane %v403_v52, 1  ;;  %v414_v63 = vrot.slane %v405_v53, 1  ;;  %s1692_s8 = sld [smem:[#allocation2 + $0x26]] }
  0x56   : > { %v428_v2 = vmul.f32 %v424_v54, %v2116_v15  ;;  %v425_v3 = vmul.f32 %v424_v54, %v2096_v0  ;;  %v389_v4 = vsel %vm303_vm0, %v387_v55, %v388_v56  ;;  %v410_v5 = vrot.slane %v402_v57, 1  ;;  %s1697_s9 = sld [smem:[#allocation2 + $0xd]] }
  0x57   : > { %v411_v6 = vrot.slane %v404_v58, 1  ;;  %v427_v7 = vmul.f32 %v424_v54, %v2119_v17  ;;  %v449_v8 = vmul.f32 %v447_v61, %v2099_v1  ;;  %v451_v9 = vmul.f32 %v447_v61, %v2116_v15  ;;  %s2241_s11 = sld [smem:[#allocation2 + $0x41]] }
  0x58   : > { %279 = vrot.lane.b32.xlu1 %v274_v18, %s1968_s10  ;;  %v436_v10 = vrot.slane %v426_v60, 1  ;;  %v415_v11 = vsel %vm303_vm0, %v413_v62, %v414_v63  ;;  %v437_v12 = vrot.slane %v428_v2, 1  ;;  %v433_v13 = vrot.slane %v425_v3, 1  ;;  %s1698_s17 = sld [smem:[#allocation2 + $0x28]] }
  0x59   : > { %277 = vrot.lane.b32.xlu0 %v273_v20, %s1968_s10  ;;  %v504_v14 = vstv %s1673_s20  ;;  %v412_v16 = vsel %vm303_vm0, %v410_v5, %v411_v6  ;;  %v434_v18 = vrot.slane %v427_v7, 1  ;;  %v448_v19 = vmul.f32 %v447_v61, %v2096_v0  ;;  %s1699_s19 = sld [smem:[#allocation2 + $0x43]] }
  0x5a   : > { %v450_v20 = vmul.f32 %v447_v61, %v2119_v17  ;;  %v459_v21 = vrot.slane %v449_v8, 1  ;;  %v460_v22 = vrot.slane %v451_v9, 1  ;;  %v506_v23 = vmul.f32 %v504_v14, %v2099_v1  ;;  %s1700_s20 = sld [smem:[#allocation2 + $0xe]] }
  0x5b   : > { %v508_v24 = vmul.f32 %v504_v14, %v2116_v15  ;;  %v438_v25 = vsel %vm303_vm0, %v436_v10, %v437_v12  ;;  %v527_v28 = vstv %s1674_s24  ;;  %v435_v29 = vsel %vm303_vm0, %v433_v13, %v434_v18  ;;  %s1701_s24 = sld [smem:[#allocation2 + $0x29]] }
  0x5c   : > { %292 = vrot.lane.b32.xlu1 %v287_v26, %s1968_s10  ;;  %v505_v26 = vmul.f32 %v504_v14, %v2096_v0  ;;  %v456_v30 = vrot.slane %v448_v19, 1  ;;  %v457_v31 = vrot.slane %v450_v20, 1  ;;  %v461_v32 = vsel %vm303_vm0, %v459_v21, %v460_v22 }
  0x5d   : > { %290 = vrot.lane.b32.xlu0 %v286_v27, %s1968_s10  ;;  %v507_v27 = vmul.f32 %v504_v14, %v2119_v17  ;;  %v516_v33 = vrot.slane %v506_v23, 2  ;;  %v517_v34 = vrot.slane %v508_v24, 2  ;;  %v529_v35 = vmul.f32 %v527_v28, %v2099_v1 }
  0x5e   : > { %v531_v36 = vmul.f32 %v527_v28, %v2116_v15  ;;  %v513_v37 = vrot.slane %v505_v26, 2  ;;  %v528_v39 = vmul.f32 %v527_v28, %v2096_v0  ;;  %v550_v40 = vstv %s1675_s25  ;;  %s1702_s25 = sld [smem:[#allocation2 + $0x44]] }
  0x5f   : > { %v514_v38 = vrot.slane %v507_v27, 2  ;;  %v530_v42 = vmul.f32 %v527_v28, %v2119_v17  ;;  %v539_v43 = vrot.slane %v529_v35, 2  ;;  %v552_v45 = vmul.f32 %v550_v40, %v2099_v1 }
  0x60   : > { %349 = vrot.lane.b32.xlu1 %v346_v41, %s1967_s4  ;;  %v458_v41 = vsel %vm303_vm0, %v456_v30, %v457_v31  ;;  %v554_v46 = vmul.f32 %v550_v40, %v2116_v15  ;;  %v518_v47 = vsel %vm475_vm1, %v516_v33, %v517_v34  ;;  %v536_v49 = vrot.slane %v528_v39, 2  ;;  %v2225_v31 = vld [vmem:[%s2093_s29 + $0x38] sm:$0xff]  ;;  %v2228_v33 = vld [vmem:[%s2093_s29 + $0x30] sm:$0xff] }
  0x61   : > { %347 = vrot.lane.b32.xlu0 %v343_v44, %s1967_s4  ;;  %v540_v44 = vrot.slane %v531_v36, 2  ;;  %v537_v50 = vrot.slane %v530_v42, 2  ;;  %v553_v52 = vmul.f32 %v550_v40, %v2119_v17  ;;  %v573_v53 = vstv %s1676_s26  ;;  %s1706_s26 = sld [smem:[#allocation2 + $0x10]] }
  0x62   : > { %v562_v55 = vrot.slane %v552_v45, 2  ;;  %v563_v56 = vrot.slane %v554_v46, 2  ;;  %v596_v57 = vstv %s1677_s27  ;;  %v575_v58 = vmul.f32 %v573_v53, %v2099_v1  ;;  %s1707_s27 = sld [smem:[#allocation2 + $0x2b]] }
  0x63   : > { %v541_v54 = vsel %vm475_vm1, %v539_v43, %v540_v44  ;;  %v574_v60 = vmul.f32 %v573_v53, %v2096_v0  ;;  %v576_v61 = vmul.f32 %v573_v53, %v2119_v17  ;;  %v538_v62 = vsel %vm475_vm1, %v536_v49, %v537_v50  ;;  %v2253_v49 = vld [vmem:[%s2093_s29 + $0x40] sm:$0x3] }
  0x64   : > { %372 = vrot.lane.b32.xlu1 %v369_v48, %s1967_s4  ;;  %v515_v48 = vsel %vm475_vm1, %v513_v37, %v514_v38  ;;  %v560_v2 = vrot.slane %v553_v52, 2  ;;  %v564_v3 = vsel %vm475_vm1, %v562_v55, %v563_v56  ;;  %v600_v5 = vmul.f32 %v596_v57, %v2116_v15 }
  0x65   : > { %370 = vrot.lane.b32.xlu0 %v366_v51, %s1967_s4  ;;  %v551_v51 = vmul.f32 %v550_v40, %v2096_v0  ;;  %v585_v6 = vrot.slane %v575_v58, 2  ;;  %v582_v8 = vrot.slane %v574_v60, 2  ;;  %v583_v9 = vrot.slane %v576_v61, 2 }
  0x66   : > { %v599_v12 = vmul.f32 %v596_v57, %v2119_v17  ;;  %v619_v13 = vstv %s1678_s28  ;;  %v674_v37 = vstv %s1689_s5  ;;  %v687_v40 = vstv %s1690_s6  ;;  %s1708_s28 = sld [smem:[#allocation2 + $0x46]] }
  0x67   : > { %v559_v63 = vrot.slane %v551_v51, 2  ;;  %v584_v19 = vsel %vm475_vm1, %v582_v8, %v583_v9  ;;  %v621_v20 = vmul.f32 %v619_v13, %v2099_v1  ;;  %v623_v21 = vmul.f32 %v619_v13, %v2116_v15  ;;  %s2316_s5 = sld [smem:[#allocation2 + $0x35]] }
  0x68   : > { %395 = vrot.lane.b32.xlu1 %v392_v59, %s1967_s4  ;;  %v577_v59 = vmul.f32 %v573_v53, %v2116_v15  ;;  %v606_v23 = vrot.slane %v599_v12, 2  ;;  %v620_v24 = vmul.f32 %v619_v13, %v2096_v0  ;;  %v676_v38 = vmul.f32 %v2225_v31, %v674_v37  ;;  %s2326_s6 = sld [smem:[#allocation2 + $0x50]] }
  0x69   : > { %393 = vrot.lane.b32.xlu0 %v389_v4, %s1967_s4  ;;  %v598_v4 = vmul.f32 %v596_v57, %v2099_v1  ;;  %v561_v10 = vsel %vm475_vm1, %v559_v63, %v560_v2  ;;  %v631_v27 = vrot.slane %v621_v20, 2  ;;  %v632_v28 = vrot.slane %v623_v21, 2 }
  0x6a   : > { %v586_v7 = vrot.slane %v577_v59, 2  ;;  %v628_v15 = vrot.slane %v620_v24, 2  ;;  %v675_v39 = vmul.f32 %v2228_v33, %v674_v37  ;;  %v688_v42 = vmul.f32 %v2228_v33, %v687_v40 }
  0x6b   : > { %v608_v14 = vrot.slane %v598_v4, 2  ;;  %v633_v30 = vsel %vm475_vm1, %v631_v27, %v632_v28  ;;  %v700_v43 = vstv %s1691_s7  ;;  %v713_v46 = vstv %s1692_s8  ;;  %s2331_s7 = sld [smem:[#allocation2 + $0x2c]] }
  0x6c   : > { %418 = vrot.lane.b32.xlu1 %v415_v11, %s1968_s10  ;;  %v597_v11 = vmul.f32 %v596_v57, %v2096_v0  ;;  %v587_v18 = vsel %vm475_vm1, %v585_v6, %v586_v7  ;;  %v702_v44 = vmul.f32 %v2225_v31, %v700_v43  ;;  %v701_v45 = vmul.f32 %v2228_v33, %v700_v43  ;;  %s2338_s8 = sld [smem:[#allocation2 + $0x1b]] }
  0x6d   : > { %416 = vrot.lane.b32.xlu0 %v412_v16, %s1968_s10  ;;  %v609_v16 = vrot.slane %v600_v5, 2  ;;  %v715_v50 = vmul.f32 %v2225_v31, %v713_v46  ;;  %v714_v51 = vmul.f32 %v2228_v33, %v713_v46  ;;  %v726_v52 = vstv %s2241_s11  ;;  %s2349_s11 = sld [smem:[#allocation2 + $0x36]] }
  0x6e   : > { %v605_v22 = vrot.slane %v597_v11, 2  ;;  %v795_v55 = vstv %s1698_s17  ;;  %v728_v58 = vmul.f32 %v2225_v31, %v726_v52  ;;  %v727_v61 = vmul.f32 %v2228_v33, %v726_v52  ;;  %s2366_s17 = sld [smem:[#allocation2 + $0x13]] }
  0x6f   : > { %v610_v26 = vsel %vm475_vm1, %v608_v14, %v609_v16  ;;  %v797_v59 = vmul.f32 %v2225_v31, %v795_v55  ;;  %v818_v2 = vstv %s1699_s19  ;;  %v796_v5 = vmul.f32 %v2228_v33, %v795_v55  ;;  %s2372_s19 = sld [smem:[#allocation2]] }
  0x70   : > { %441 = vrot.lane.b32.xlu1 %v438_v25, %s1968_s10  ;;  %v622_v25 = vmul.f32 %v619_v13, %v2119_v17  ;;  %v607_v1 = vsel %vm475_vm1, %v605_v22, %v606_v23  ;;  %v798_v6 = vmul.f32 %v2253_v49, %v795_v55  ;;  %v820_v9 = vmul.f32 %v2225_v31, %v818_v2 }
  0x71   : > { %439 = vrot.lane.b32.xlu0 %v435_v29, %s1968_s10  ;;  %v807_v7 = vrot.slane %v797_v59, 1  ;;  %v819_v12 = vmul.f32 %v2228_v33, %v818_v2  ;;  %v821_v13 = vmul.f32 %v2253_v49, %v818_v2  ;;  %v841_v14 = vstv %s1700_s20  ;;  %s2386_s20 = sld [smem:[#allocation2 + $0x3]] }
  0x72   : > { %v629_v29 = vrot.slane %v622_v25, 2  ;;  %v830_v21 = vrot.slane %v820_v9, 1  ;;  %v843_v23 = vmul.f32 %v2225_v31, %v841_v14  ;;  %v864_v27 = vstv %s1701_s24  ;;  %s2391_s24 = sld [smem:[#allocation2 + $0x2e]] }
  0x73   : > { %v827_v24 = vrot.slane %v819_v12, 1  ;;  %v828_v25 = vrot.slane %v821_v13, 1  ;;  %v887_v37 = vstv %s1702_s25  ;;  %s2394_s25 = sld [smem:[#allocation2 + $0x39]] }
  0x74   : > { %464 = vrot.lane.b32.xlu1 %v461_v32, %s1968_s10  ;;  %v661_v32 = vstv %s1688_s30  ;;  %v630_v34 = vsel %vm475_vm1, %v628_v15, %v629_v29  ;;  %v844_v15 = vmul.f32 %v2253_v49, %v841_v14  ;;  %s2309_s30 = sld [smem:[#allocation2 + $0x11]] }
  0x75   : > { %462 = vrot.lane.b32.xlu0 %v458_v41, %s1968_s10  ;;  %v663_v35 = vmul.f32 %v2225_v31, %v661_v32  ;;  %v662_v36 = vmul.f32 %v2228_v33, %v661_v32  ;;  %v689_v41 = vmul.f32 %v2225_v31, %v687_v40  ;;  %v865_v40 = vmul.f32 %v2228_v33, %v864_v27 }
  0x77   : > { %v873_v52 = vrot.slane %v865_v40, 1  ;;  %v2361_v40 = vld [vmem:[%s2093_s29 + $0x78] sm:$0x3] }
  0x78   : > { %521 = vrot.lane.b32.xlu1 %v518_v47, %s1967_s4  ;;  %v2250_v47 = vld [vmem:[%s2093_s29 + $0x48] sm:$0x3] }
  0x79   : > { %519 = vrot.lane.b32.xlu0 %v515_v48, %s1967_s4  ;;  %v772_v48 = vstv %s1697_s9  ;;  %v799_v60 = vmul.f32 %v2250_v47, %v795_v55  ;;  %v868_v32 = vmul.f32 %v2250_v47, %v864_v27  ;;  %s2344_s9 = sld [smem:[#allocation7]] }
  0x7a   : > { %v774_v53 = vmul.f32 %v2225_v31, %v772_v48  ;;  %v773_v56 = vmul.f32 %v2228_v33, %v772_v48  ;;  %v775_v57 = vmul.f32 %v2253_v49, %v772_v48 }
  0x7b   : > { %v808_v8 = vrot.slane %v799_v60, 1  ;;  %v877_v43 = vrot.slane %v868_v32, 1 }
  0x7c   : > { %544 = vrot.lane.b32.xlu1 %v541_v54, %s1967_s4  ;;  %v776_v54 = vmul.f32 %v2250_v47, %v772_v48  ;;  %v782_v4 = vrot.slane %v775_v57, 1  ;;  %v888_v48 = vmul.f32 %v2228_v33, %v887_v37 }
  0x7d   : > { %542 = vrot.lane.b32.xlu0 %v538_v62, %s1967_s4  ;;  %v784_v62 = vrot.slane %v774_v53, 1  ;;  %v809_v20 = vsel %vm303_vm0, %v807_v7, %v808_v8 }
  0x7e   : > { %v785_v63 = vrot.slane %v776_v54, 1  ;;  %v943_v54 = vstv %s1706_s26  ;;  %v896_v59 = vrot.slane %v888_v48, 1  ;;  %s2401_s26 = sld [smem:[#allocation7 + $0x2]] }
  0x80   : > { %567 = vrot.lane.b32.xlu1 %v564_v3, %s1967_s4  ;;  %v781_v3 = vrot.slane %v773_v56, 1  ;;  %v786_v11 = vsel %vm303_vm0, %v784_v62, %v785_v63  ;;  %v947_v62 = vmul.f32 %v2250_v47, %v943_v54 }
  0x81   : > { %565 = vrot.lane.b32.xlu0 %v561_v10, %s1967_s4  ;;  %v822_v10 = vmul.f32 %v2250_v47, %v818_v2  ;;  %v944_v2 = vmul.f32 %v2228_v33, %v943_v54 }
  0x82   : > { %v783_v16 = vsel %vm303_vm0, %v781_v3, %v782_v4  ;;  %v946_v3 = vmul.f32 %v2253_v49, %v943_v54 }
  0x83   : > { %v831_v22 = vrot.slane %v822_v10, 1  ;;  %v956_v10 = vrot.slane %v947_v62, 2  ;;  %v952_v12 = vrot.slane %v944_v2, 2 }
  0x84   : > { %590 = vrot.lane.b32.xlu1 %v587_v18, %s1968_s10  ;;  %v804_v18 = vrot.slane %v796_v5, 1  ;;  %v953_v13 = vrot.slane %v946_v3, 2 }
  0x85   : > { %588 = vrot.lane.b32.xlu0 %v584_v19, %s1968_s10  ;;  %v805_v19 = vrot.slane %v798_v6, 1  ;;  %v832_v29 = vsel %vm303_vm0, %v830_v21, %v831_v22  ;;  %v989_v6 = vstv %s1708_s28  ;;  %s2416_s28 = sld [smem:[#allocation2 + $0x49]] }
  0x86   : > { %v991_v21 = vmul.f32 %v2225_v31, %v989_v6  ;;  %v993_v22 = vmul.f32 %v2250_v47, %v989_v6 }
  0x87   : > { %v806_v28 = vsel %vm303_vm0, %v804_v18, %v805_v19 }
  0x88   : > { %613 = vrot.lane.b32.xlu1 %v610_v26, %s1968_s10  ;;  %v845_v26 = vmul.f32 %v2250_v47, %v841_v14  ;;  %v1001_v32 = vrot.slane %v991_v21, 2  ;;  %v206_v21 = vstv %s2372_s19  ;;  %s2508_s19 = sld [smem:[#allocation2 + $0x4c]] }
  0x89   : > { %611 = vrot.lane.b32.xlu0 %v607_v1, %s1968_s10  ;;  %v842_v1 = vmul.f32 %v2228_v33, %v841_v14 }
  0x8c   : > { %636 = vrot.lane.b32.xlu1 %v633_v30, %s1968_s10  ;;  %v866_v30 = vmul.f32 %v2225_v31, %v864_v27 }
  0x8d   : > { %634 = vrot.lane.b32.xlu0 %v630_v34, %s1968_s10  ;;  %v829_v34 = vsel %vm303_vm0, %v827_v24, %v828_v25  ;;  %v992_v24 = vmul.f32 %v2253_v49, %v989_v6 }
  0x90   : > { %668 = vrot.lane.b32.xlu1 %v663_v35, %s1967_s4  ;;  %v853_v35 = vrot.slane %v843_v23, 1  ;;  %v990_v23 = vmul.f32 %v2228_v33, %v989_v6 }
  0x91   : > { %666 = vrot.lane.b32.xlu0 %v662_v36, %s1967_s4  ;;  %v854_v36 = vrot.slane %v845_v26, 1  ;;  %v1012_v26 = vstv %s2309_s30  ;;  %s2421_s30 = sld [smem:[#allocation7 + $0x1]] }
  0x92   : > { %v1015_v48 = vmul.f32 %v2253_v49, %v1012_v26 }
  0x93   : > { %v855_v46 = vsel %vm303_vm0, %v853_v35, %v854_v36  ;;  %v1002_v35 = vrot.slane %v993_v22, 2  ;;  %v998_v36 = vrot.slane %v990_v23, 2 }
  0x94   : > { %681 = vrot.lane.b32.xlu1 %v676_v38, %s1967_s4  ;;  %v850_v38 = vrot.slane %v842_v1, 1 }
  0x95   : > { %679 = vrot.lane.b32.xlu0 %v675_v39, %s1967_s4  ;;  %v851_v39 = vrot.slane %v844_v15, 1 }
  0x98   : > { %694 = vrot.lane.b32.xlu1 %v689_v41, %s1967_s4  ;;  %v867_v41 = vmul.f32 %v2253_v49, %v864_v27 }
  0x99   : > { %692 = vrot.lane.b32.xlu0 %v688_v42, %s1967_s4  ;;  %v876_v42 = vrot.slane %v866_v30, 1 }
  0x9a   : > { %v874_v53 = vrot.slane %v867_v41, 1  ;;  %v1016_v41 = vmul.f32 %v2250_v47, %v1012_v26 }
  0x9b   : > { %v878_v55 = vsel %vm303_vm0, %v876_v42, %v877_v43  ;;  %v1013_v42 = vmul.f32 %v2228_v33, %v1012_v26 }
  0x9c   : > { %707 = vrot.lane.b32.xlu1 %v702_v44, %s1968_s10  ;;  %v889_v44 = vmul.f32 %v2225_v31, %v887_v37  ;;  %v875_v63 = vsel %vm303_vm0, %v873_v52, %v874_v53  ;;  %v2384_v52 = vstv %s2331_s7  ;;  %s2461_s7 = sld [smem:[#allocation2 + $0x16]] }
  0x9d   : > { %705 = vrot.lane.b32.xlu0 %v701_v45, %s1968_s10  ;;  %v891_v45 = vmul.f32 %v2250_v47, %v887_v37  ;;  %v1036_v2 = vmul.f32 %v2228_v33, %v2384_v52  ;;  %v1038_v3 = vmul.f32 %v2253_v49, %v2384_v52 }
  0x9e   : > { %v899_v56 = vrot.slane %v889_v44, 1 }
  0x9f   : > { %v900_v57 = vrot.slane %v891_v45, 1 }
  0xa0   : > { %720 = vrot.lane.b32.xlu1 %v715_v50, %s1968_s10  ;;  %v890_v50 = vmul.f32 %v2253_v49, %v887_v37  ;;  %v999_v37 = vrot.slane %v992_v24, 2  ;;  %v298_v24 = vstv %s2386_s20  ;;  %s2523_s20 = sld [smem:[#allocation2 + $0x3c]] }
  0xa1   : > { %718 = vrot.lane.b32.xlu0 %v714_v51, %s1968_s10  ;;  %v852_v51 = vsel %vm303_vm0, %v850_v38, %v851_v39  ;;  %v901_v7 = vsel %vm303_vm0, %v899_v56, %v900_v57  ;;  %v1014_v38 = vmul.f32 %v2225_v31, %v1012_v26  ;;  %v2358_v39 = vld [vmem:[%s2093_s29 + $0x68] sm:$0xff]  ;;  %v210_v26 = vstv %s2338_s8  ;;  %s2467_s8 = sld [smem:[#allocation2 + $0x6]] }
  0xa2   : > { %v897_v60 = vrot.slane %v890_v50, 1  ;;  %v2379_v50 = vstv %s2326_s6  ;;  %v1000_v56 = vsel %vm475_vm1, %v998_v36, %v999_v37  ;;  %s2454_s6 = sld [smem:[#allocation2 + $0x2f]] }
  0xa3   : > { %v1024_v57 = vrot.slane %v1014_v38, 2  ;;  %v299_v38 = vmul.f32 %v298_v24, %v2096_v0 }
  0xa4   : > { %733 = vrot.lane.b32.xlu1 %v728_v58, %s1968_s10  ;;  %v966_v58 = vstv %s1707_s27  ;;  %v898_v8 = vsel %vm303_vm0, %v896_v59, %v897_v60  ;;  %v1021_v59 = vrot.slane %v1013_v42, 2  ;;  %s2413_s27 = sld [smem:[#allocation2 + $0x1e]] }
  0xa5   : > { %731 = vrot.lane.b32.xlu0 %v727_v61, %s1968_s10  ;;  %v945_v61 = vmul.f32 %v2225_v31, %v943_v54  ;;  %v968_v4 = vmul.f32 %v2225_v31, %v966_v58  ;;  %v970_v5 = vmul.f32 %v2250_v47, %v966_v58  ;;  %v967_v14 = vmul.f32 %v2228_v33, %v966_v58 }
  0xa7   : > { %v955_v9 = vrot.slane %v945_v61, 2  ;;  %v978_v19 = vrot.slane %v968_v4, 2  ;;  %v975_v1 = vrot.slane %v967_v14, 2  ;;  %v1499_v61 = vmul.f32 %v2358_v39, %v2379_v50 }
  0xa8   : > { %789 = vrot.lane.b32.xlu1 %v786_v11, %s1967_s4  ;;  %v1501_v4 = vmul.f32 %v2361_v40, %v2379_v50 }
  0xa9   : > { %787 = vrot.lane.b32.xlu0 %v783_v16, %s1967_s4  ;;  %v969_v16 = vmul.f32 %v2253_v49, %v966_v58  ;;  %v957_v25 = vsel %vm475_vm1, %v955_v9, %v956_v10  ;;  %v1025_v58 = vrot.slane %v1016_v41, 2  ;;  %v1509_v6 = vrot.slane %v1499_v61, 2 }
  0xaa   : > { %v214_v9 = vstv %s2349_s11  ;;  %v300_v41 = vmul.f32 %v298_v24, %v2119_v17  ;;  %s2485_s11 = sld [smem:[#allocation2 + $0x31]] }
  0xab   : > { %v976_v15 = vrot.slane %v969_v16, 2  ;;  %v1026_v10 = vsel %vm475_vm1, %v1024_v57, %v1025_v58  ;;  %v1044_v16 = vrot.slane %v1036_v2, 2 }
  0xac   : > { %812 = vrot.lane.b32.xlu1 %v809_v20, %s1967_s4  ;;  %v979_v20 = vrot.slane %v970_v5, 2 }
  0xad   : > { %810 = vrot.lane.b32.xlu0 %v806_v28, %s1967_s4  ;;  %v954_v28 = vsel %vm475_vm1, %v952_v12, %v953_v13  ;;  %v1100_v12 = vstv %s2366_s17  ;;  %s2492_s17 = sld [smem:[#allocation2 + $0x21]] }
  0xae   : > { %v980_v30 = vsel %vm475_vm1, %v978_v19, %v979_v20  ;;  %v1045_v19 = vrot.slane %v1038_v3, 2  ;;  %v1102_v57 = vmul.f32 %v2358_v39, %v1100_v12  ;;  %v304_v3 = vrot.slane %v299_v38, 1 }
  0xb0   : > { %835 = vrot.lane.b32.xlu1 %v832_v29, %s1967_s4  ;;  %v1046_v36 = vsel %vm475_vm1, %v1044_v16, %v1045_v19 }
  0xb1   : > { %833 = vrot.lane.b32.xlu0 %v829_v34, %s1967_s4  ;;  %v2353_v34 = vstv %s2316_s5  ;;  %s2436_s5 = sld [smem:[#allocation2 + $0x14]] }
  0xb2   : > { %v1476_v43 = vmul.f32 %v2358_v39, %v2353_v34  ;;  %v1478_v44 = vmul.f32 %v2361_v40, %v2353_v34 }
  0xb4   : > { %858 = vrot.lane.b32.xlu1 %v855_v46, %s1968_s10  ;;  %v977_v46 = vsel %vm475_vm1, %v975_v1, %v976_v15  ;;  %v1486_v53 = vrot.slane %v1476_v43, 2  ;;  %v1487_v54 = vrot.slane %v1478_v44, 2  ;;  %v321_v1 = vstv %s2394_s25  ;;  %s2540_s25 = sld [smem:[#allocation2 + $0x32]] }
  0xb5   : > { %856 = vrot.lane.b32.xlu0 %v852_v51, %s1968_s10  ;;  %v191_v15 = vstv %s2344_s9  ;;  %v310_v43 = vstv %s2413_s27  ;;  %s2474_s9 = sld [smem:[#allocation2 + $0x4a]] }
  0xb6   : > { %v2397_v60 = vsel %vm475_vm1, %v1486_v53, %v1487_v54  ;;  %v323_v53 = vmul.f32 %v321_v1, %v2119_v17  ;;  %v193_v54 = vstv %s2421_s30  ;;  %v312_v2 = vmul.f32 %v310_v43, %v2119_v17  ;;  %s2579_s27 = sld [smem:[#allocation2 + $0x47]] }
  0xb7   : > { %s2604_s30 = sld [smem:[#allocation2 + $0x34]] }
  0xb8   : > { %881 = vrot.lane.b32.xlu1 %v878_v55, %s1968_s10  ;;  %v1003_v55 = vsel %vm475_vm1, %v1001_v32, %v1002_v35  ;;  %v195_v32 = vstv %s2401_s26  ;;  %s2557_s26 = sld [smem:[#allocation2 + $0x4d]] }
  0xb9   : > { %879 = vrot.lane.b32.xlu0 %v875_v63, %s1968_s10  ;;  %v1022_v63 = vrot.slane %v1015_v48, 2  ;;  %v322_v48 = vmul.f32 %v321_v1, %v2096_v0 }
  0xba   : > { %v2322_v11 = vpop.permute.xlu1 %237 }
  0xbb   : > { %v2328_v18 = vpop.permute.xlu0 %223  ;;  %v1023_v14 = vsel %vm475_vm1, %v1021_v59, %v1022_v63  ;;  %v311_v63 = vmul.f32 %v310_v43, %v2096_v0 }
  0xbc   : > { %904 = vrot.lane.b32.xlu1 %v901_v7, %s1968_s10  ;;  %v1510_v7 = vrot.slane %v1501_v4, 2  ;;  %v305_v4 = vrot.slane %v300_v41, 1 }
  0xbd   : > { %902 = vrot.lane.b32.xlu0 %v898_v8, %s1968_s10  ;;  %v2419_v8 = vld [vmem:[%s2093_s29 + $0x60] sm:$0xff]  ;;  %v315_v19 = vrot.slane %v311_v63, 1 }
  0xbe   : > { %v2342_v27 = vpop.permute.xlu1 %239  ;;  %v2431_v20 = vsel %vm475_vm1, %v1509_v6, %v1510_v7  ;;  %v1101_v23 = vmul.f32 %v2419_v8, %v1100_v12 }
  0xbf   : > { %v2347_v29 = vpop.permute.xlu0 %225  ;;  %v241_v1 = vsel %vm227_vm2, %v2322_v11, %v2342_v27 }
  0xc0   : > { %960 = vrot.lane.b32.xlu1 %v957_v25, %s1967_s4  ;;  %v1113_v25 = vstv %s2391_s24  ;;  %s2533_s24 = sld [smem:[#allocation2 + $0x17]] }
  0xc1   : > { %958 = vrot.lane.b32.xlu0 %v954_v28, %s1967_s4  ;;  %v215_v28 = vmul.f32 %v214_v9, %v2096_v0  ;;  %v1114_v42 = vmul.f32 %v2419_v8, %v1113_v25  ;;  %v1139_v9 = vstv %s2436_s5  ;;  %s2621_s5 = sld [smem:[#allocation2 + $0x4f]] }
  0xc2   : > { %v2374_v45 = vpop.permute.xlu1 %252  ;;  %v1141_v41 = vmul.f32 %v2358_v39, %v1139_v9 }
  0xc3   : > { %v2381_v51 = vpop.permute.xlu0 %250 }
  0xc4   : > { %983 = vrot.lane.b32.xlu1 %v980_v30, %s1967_s4  ;;  %v207_v30 = vmul.f32 %v206_v21, %v2096_v0  ;;  %v254_v59 = vsel %vm227_vm2, %v2381_v51, %v2374_v45  ;;  %v326_v45 = vrot.slane %v322_v48, 1  ;;  %v316_v21 = vrot.slane %v312_v2, 1 }
  0xc5   : > { %981 = vrot.lane.b32.xlu0 %v977_v46, %s1967_s4  ;;  %v1126_v46 = vstv %s2416_s28  ;;  %s2588_s28 = sld [smem:[#allocation2 + $0x19]] }
  0xc6   : > { %v2403_v62 = vpop.permute.xlu1 %265  ;;  %v208_v58 = vadd.f32 %v207_v30, %v191_v15  ;;  %v1127_v7 = vmul.f32 %v2419_v8, %v1126_v46  ;;  %v2501_v15 = vld [vmem:[%s2093_s29 + $0x70] sm:$0x3]  ;;  %v1211_v30 = vstv %s2461_s7  ;;  %v317_v27 = vsel %vm303_vm0, %v315_v19, %v316_v21  ;;  %s2637_s7 = sld [smem:[#allocation2 + $0x9]] }
  0xc7   : > { %v2411_v5 = vpop.permute.xlu0 %263  ;;  %v1257_v19 = vstv %s2508_s19  ;;  %s2687_s19 = sld [smem:[#allocation2 + $0x42]] }
  0xc8   : > { %1006 = vrot.lane.b32.xlu1 %v1003_v55, %s1967_s4  ;;  %v211_v55 = vmul.f32 %v210_v26, %v2096_v0  ;;  %v327_v0 = vrot.slane %v323_v53, 1  ;;  %v306_v26 = vsel %vm303_vm0, %v304_v3, %v305_v4  ;;  %v1214_v53 = vmul.f32 %v2501_v15, %v1211_v30 }
  0xc9   : > { %1004 = vrot.lane.b32.xlu0 %v1000_v56, %s1967_s4  ;;  %v216_v56 = vadd.f32 %v215_v28, %v195_v32 }
  0xca   : > { %v2427_v13 = vpop.permute.xlu1 %279  ;;  %v212_v16 = vadd.f32 %v211_v55, %v193_v54 }
  0xcb   : > { %v2434_v22 = vpop.permute.xlu0 %277  ;;  %v256_v51 = vadd.f32 %v254_v59, %v216_v56 }
  0xcc   : > { %1029 = vrot.lane.b32.xlu1 %v1026_v10, %s1968_s10  ;;  %v228_v10 = vsel %vm227_vm2, %v2328_v18, %v2347_v29  ;;  %v268_v18 = vsel %vm267_vm3, %v2411_v5, %v2403_v62  ;;  %v328_v5 = vsel %vm303_vm0, %v326_v45, %v327_v0  ;;  %v281_v11 = vsel %vm267_vm3, %v2434_v22, %v2427_v13  ;;  %v1831_v22 = vld [vmem:[%s2093_s29] sm:$0xff] }
  0xcd   : > { %1027 = vrot.lane.b32.xlu0 %v1023_v14, %s1968_s10  ;;  %v1115_v14 = vmul.f32 %v2358_v39, %v1113_v25  ;;  %v1140_v25 = vmul.f32 %v2419_v8, %v1139_v9  ;;  %v243_v43 = vadd.f32 %v241_v1, %v212_v16  ;;  %v482_v45 = vstv %s2492_s17  ;;  %s2676_s17 = sld [smem:[#allocation2 + $0x27]] }
  0xce   : > { %v293_v35 = vpop.permute.xlu1 %292 }
  0xcf   : > { %v291_v37 = vpop.permute.xlu0 %290 }
  0xd0   : > { %v294_v44 = vsel %vm267_vm3, %v291_v37, %v293_v35  ;;  %1105 = vrot.lane.b32.xlu1 %v1101_v23, %s1967_s4  ;;  %v230_v23 = vadd.f32 %v228_v10, %v208_v58  ;;  %v1128_v35 = vmul.f32 %v2358_v39, %v1126_v46  ;;  %v470_v37 = vstv %s2467_s8  ;;  %s2651_s8 = sld [smem:[#allocation2 + $0x24]] }
  0xd1   : > { %1050 = vrot.lane.b32.xlu0 %v1046_v36, %s1968_s10  ;;  %v296_v24 = vadd.f32 %v294_v44, %v256_v51  ;;  %v1152_v36 = vstv %s2454_s6  ;;  %v1212_v46 = vmul.f32 %v2419_v8, %v1211_v30  ;;  %v471_v55 = vmul.f32 %v1831_v22, %v470_v37  ;;  %s2634_s6 = sld [smem:[#allocation2 + $0x1a]] }
  0xd2   : > { %v350_v61 = vpop.permute.xlu1 %349  ;;  %v270_v32 = vadd.f32 %v268_v18, %v230_v23  ;;  %v1153_v13 = vmul.f32 %v2419_v8, %v1152_v36  ;;  %v472_v56 = vmul.f32 %v470_v37, %v2119_v17  ;;  %v1154_v3 = vmul.f32 %v2358_v39, %v1152_v36 }
  0xd3   : > { %v348_v6 = vpop.permute.xlu0 %347  ;;  %v330_v48 = vadd.f32 %v328_v5, %v296_v24  ;;  %v1220_v9 = vrot.slane %v1212_v46, 1  ;;  %v1221_v10 = vrot.slane %v1214_v53, 1  ;;  %v476_v51 = vrot.slane %v471_v55, 2 }
  0xd4   : > { %v351_v12 = vsel %vm227_vm2, %v348_v6, %v350_v61  ;;  %1118 = vrot.lane.b32.xlu1 %v1114_v42, %s1967_s4  ;;  %v1165_v42 = vstv %s2474_s9  ;;  %v308_v58 = vadd.f32 %v306_v26, %v270_v32  ;;  %v1234_v61 = vstv %s2485_s11  ;;  %s2656_s9 = sld [smem:[#allocation2 + $0xc]] }
  0xd5   : > { %1107 = vrot.lane.b32.xlu0 %v1102_v57, %s1967_s4  ;;  %v283_v57 = vadd.f32 %v281_v11, %v243_v43  ;;  %v1166_v2 = vmul.f32 %v2419_v8, %v1165_v42  ;;  %v1167_v4 = vmul.f32 %v2358_v39, %v1165_v42  ;;  %v2531_v6 = vmul.f32 %v2358_v39, %v1211_v30  ;;  %s2668_s11 = sld [smem:[#allocation2 + $0x3f]] }
  0xd6   : > { %v373_v29 = vpop.permute.xlu1 %372  ;;  %v353_v17 = vadd.f32 %v351_v12, %v308_v58  ;;  %v1237_v16 = vmul.f32 %v2501_v15, %v1234_v61  ;;  %v477_v12 = vrot.slane %v472_v56, 2  ;;  %v1215_v23 = vmul.f32 %v2361_v40, %v1211_v30 }
  0xd7   : > { %v371_v28 = vpop.permute.xlu0 %370  ;;  %v319_v18 = vadd.f32 %v317_v27, %v283_v57  ;;  %v1223_v24 = vrot.slane %v2531_v6, 1  ;;  %v483_v26 = vmul.f32 %v1831_v22, %v482_v45  ;;  %v1222_v32 = vsel %vm303_vm0, %v1220_v9, %v1221_v10 }
  0xd8   : > { %v374_v62 = vsel %vm227_vm2, %v371_v28, %v373_v29  ;;  %1131 = vrot.lane.b32.xlu1 %v1127_v7, %s1967_s4  ;;  %v1832_v28 = vld [vmem:[%s2093_s29 + $0x10] sm:$0x3]  ;;  %v1238_v36 = vmul.f32 %v2361_v40, %v1234_v61  ;;  %v1258_v30 = vmul.f32 %v2419_v8, %v1257_v19  ;;  %v1260_v11 = vmul.f32 %v2501_v15, %v1257_v19 }
  0xd9   : > { %1120 = vrot.lane.b32.xlu0 %v1115_v14, %s1967_s4  ;;  %v1235_v14 = vmul.f32 %v2419_v8, %v1234_v61  ;;  %v376_v1 = vadd.f32 %v374_v62, %v319_v18  ;;  %v493_v27 = vstv %s2523_s20  ;;  %v478_v62 = vsel %vm475_vm1, %v476_v51, %v477_v12  ;;  %s1704_s20 = sld [smem:[#allocation2 + $0x2a]] }
  0xda   : > { %v396_v38 = vpop.permute.xlu1 %395  ;;  %v1244_v42 = vrot.slane %v1237_v16, 1  ;;  %v1280_v53 = vstv %s2533_s24  ;;  %v1247_v55 = vrot.slane %v1238_v36, 1  ;;  %v494_v56 = vmul.f32 %v1831_v22, %v493_v27  ;;  %s1705_s24 = sld [smem:[#allocation2 + $0x45]] }
  0xdb   : > { %v394_v44 = vpop.permute.xlu0 %393  ;;  %v495_v57 = vmul.f32 %v1832_v28, %v493_v27 }
  0xdc   : > { %v397_v54 = vsel %vm227_vm2, %v394_v44, %v396_v38  ;;  %1144 = vrot.lane.b32.xlu1 %v1140_v25, %s1968_s10  ;;  %v484_v25 = vmul.f32 %v1832_v28, %v482_v45  ;;  %v1224_v44 = vrot.slane %v1215_v23, 1  ;;  %v1259_v45 = vmul.f32 %v2358_v39, %v1257_v19 }
  0xdd   : > { %v399_v59 = vadd.f32 %v397_v54, %v330_v48  ;;  %1133 = vrot.lane.b32.xlu0 %v1128_v35, %s1967_s4  ;;  %v1236_v35 = vmul.f32 %v2358_v39, %v1234_v61  ;;  %v487_v48 = vrot.slane %v483_v26, 2  ;;  %v1266_v61 = vrot.slane %v1258_v30, 1 }
  0xde   : > { %v419_v63 = vpop.permute.xlu1 %418  ;;  %v488_v46 = vrot.slane %v484_v25, 2  ;;  %v1225_v22 = vsel %vm303_vm0, %v1223_v24, %v1224_v44  ;;  %v1269_v25 = vrot.slane %v1259_v45, 1 }
  0xdf   : > { %v417_v7 = vpop.permute.xlu0 %416 }
  0xe0   : > { %v420_v0 = vsel %vm267_vm3, %v417_v7, %v419_v63  ;;  %1157 = vrot.lane.b32.xlu1 %v1153_v13, %s1968_s10  ;;  %v1246_v13 = vrot.slane %v1236_v35, 1  ;;  %v1267_v63 = vrot.slane %v1260_v11, 1  ;;  %v1283_v7 = vmul.f32 %v2501_v15, %v1280_v53 }
  0xe1   : > { %v422_v29 = vadd.f32 %v420_v0, %v353_v17  ;;  %1146 = vrot.lane.b32.xlu0 %v1141_v41, %s1968_s10  ;;  %v1243_v41 = vrot.slane %v1235_v14, 1  ;;  %v1281_v17 = vmul.f32 %v2419_v8, %v1280_v53  ;;  %v489_v10 = vsel %vm475_vm1, %v487_v48, %v488_v46 }
  0xe2   : > { %v442_v21 = vpop.permute.xlu1 %441  ;;  %v1261_v0 = vmul.f32 %v2361_v40, %v1257_v19  ;;  %v498_v14 = vrot.slane %v494_v56, 2  ;;  %v1268_v12 = vsel %vm303_vm0, %v1266_v61, %v1267_v63  ;;  %v1290_v26 = vrot.slane %v1283_v7, 1 }
  0xe3   : > { %v440_v5 = vpop.permute.xlu0 %439  ;;  %v1245_v6 = vsel %vm303_vm0, %v1243_v41, %v1244_v42  ;;  %v1289_v19 = vrot.slane %v1281_v17, 1  ;;  %v1037_v56 = vmul.f32 %v2225_v31, %v2384_v52  ;;  %v1058_v7 = vstv %s2579_s27  ;;  %s2782_s27 = sld [smem:[#allocation2 + $0x48]] }
  0xe4   : > { %v443_v37 = vsel %vm267_vm3, %v440_v5, %v442_v21  ;;  %1170 = vrot.lane.b32.xlu1 %v1166_v2, %s1968_s10  ;;  %v1303_v2 = vstv %s2540_s25  ;;  %v1248_v21 = vsel %vm303_vm0, %v1246_v13, %v1247_v55  ;;  %v1282_v5 = vmul.f32 %v2358_v39, %v1280_v53  ;;  %s1718_s25 = sld [smem:[#allocation2 + $0x12]] }
  0xe5   : > { %v445_v38 = vadd.f32 %v443_v37, %v376_v1  ;;  %1159 = vrot.lane.b32.xlu0 %v1154_v3, %s1968_s10  ;;  %v1304_v16 = vmul.f32 %v2419_v8, %v1303_v2  ;;  %v1306_v23 = vmul.f32 %v2501_v15, %v1303_v2  ;;  %v1270_v1 = vrot.slane %v1261_v0, 1 }
  0xe6   : > { %v465_v43 = vpop.permute.xlu1 %464  ;;  %v1305_v41 = vmul.f32 %v2358_v39, %v1303_v2  ;;  %v1307_v44 = vmul.f32 %v2361_v40, %v1303_v2  ;;  %v1047_v0 = vrot.slane %v1037_v56, 2 }
  0xe7   : > { %v463_v54 = vpop.permute.xlu0 %462  ;;  %v491_v36 = vadd.f32 %v489_v10, %v445_v38  ;;  %v1312_v30 = vrot.slane %v1304_v16, 1  ;;  %v1313_v27 = vrot.slane %v1306_v23, 1  ;;  %v1271_v46 = vsel %vm303_vm0, %v1269_v25, %v1270_v1 }
  0xe8   : > { %v466_v58 = vsel %vm267_vm3, %v463_v54, %v465_v43  ;;  %1226 = vrot.lane.b32.xlu1 %v1222_v32, %s1967_s4  ;;  %v1284_v32 = vmul.f32 %v2361_v40, %v1280_v53  ;;  %v1291_v43 = vsel %vm303_vm0, %v1289_v19, %v1290_v26  ;;  %v1292_v53 = vrot.slane %v1282_v5, 1 }
  0xe9   : > { %v468_v3 = vadd.f32 %v466_v58, %v399_v59  ;;  %1172 = vrot.lane.b32.xlu0 %v1167_v4, %s1968_s10  ;;  %v480_v59 = vadd.f32 %v478_v62, %v422_v29  ;;  %v499_v4 = vrot.slane %v495_v57, 2  ;;  %v1326_v29 = vstv %s2557_s26  ;;  %s2780_s26 = sld [smem:[#allocation2 + $0x2d]] }
  0xea   : > { %v522_v9 = vpop.permute.xlu1 %521  ;;  %v1327_v62 = vmul.f32 %v2419_v8, %v1326_v29  ;;  %v1329_v38 = vmul.f32 %v2501_v15, %v1326_v29  ;;  %v1293_v54 = vrot.slane %v1284_v32, 1  ;;  %v1039_v57 = vmul.f32 %v2250_v47, %v2384_v52 }
  0xeb   : > { %v520_v51 = vpop.permute.xlu0 %519  ;;  %v500_v37 = vsel %vm475_vm1, %v498_v14, %v499_v4  ;;  %v1314_v61 = vsel %vm303_vm0, %v1312_v30, %v1313_v27  ;;  %v1315_v2 = vrot.slane %v1305_v41, 1  ;;  %v1330_v10 = vmul.f32 %v2361_v40, %v1326_v29 }
  0xec   : > { %v523_v18 = vsel %vm227_vm2, %v520_v51, %v522_v9  ;;  %1249 = vrot.lane.b32.xlu1 %v1245_v6, %s1967_s4  ;;  %v502_v55 = vadd.f32 %v500_v37, %v468_v3  ;;  %v1335_v63 = vrot.slane %v1327_v62, 1  ;;  %v1336_v17 = vrot.slane %v1329_v38, 1 }
  0xed   : > { %v525_v24 = vadd.f32 %v523_v18, %v480_v59  ;;  %1228 = vrot.lane.b32.xlu0 %v1225_v22, %s1967_s4  ;;  %v1316_v3 = vrot.slane %v1307_v44, 1  ;;  %v1294_v52 = vsel %vm303_vm0, %v1292_v53, %v1293_v54  ;;  %v1328_v22 = vmul.f32 %v2358_v39, %v1326_v29 }
  0xee   : > { %v545_v28 = vpop.permute.xlu1 %544  ;;  %v1048_v51 = vrot.slane %v1039_v57, 2  ;;  %v1060_v14 = vmul.f32 %v2225_v31, %v1058_v7  ;;  %v1062_v4 = vmul.f32 %v2250_v47, %v1058_v7  ;;  %v1382_v16 = vstv %s2588_s28  ;;  %s1728_s28 = sld [smem:[#allocation2 + $0x30]] }
  0xef   : > { %v543_v35 = vpop.permute.xlu0 %542  ;;  %v1338_v19 = vrot.slane %v1328_v22, 1  ;;  %v1339_v26 = vrot.slane %v1330_v10, 1  ;;  %v1059_v29 = vmul.f32 %v2228_v33, %v1058_v7  ;;  %v1386_v32 = vmul.f32 %v2361_v40, %v1382_v16 }
  0xf0   : > { %v546_v11 = vsel %vm227_vm2, %v543_v35, %v545_v28  ;;  %1272 = vrot.lane.b32.xlu1 %v1268_v12, %s1967_s4  ;;  %v1337_v12 = vsel %vm303_vm0, %v1335_v63, %v1336_v17  ;;  %v1061_v28 = vmul.f32 %v2253_v49, %v1058_v7  ;;  %v1049_v47 = vsel %vm475_vm1, %v1047_v0, %v1048_v51 }
  0xf1   : > { %v548_v42 = vadd.f32 %v546_v11, %v491_v36  ;;  %1251 = vrot.lane.b32.xlu0 %v1248_v21, %s1967_s4  ;;  %v1317_v21 = vsel %vm303_vm0, %v1315_v2, %v1316_v3  ;;  %v1070_v1 = vrot.slane %v1060_v14, 2  ;;  %v1071_v5 = vrot.slane %v1062_v4, 2 }
  0xf2   : > { %v568_v48 = vpop.permute.xlu1 %567  ;;  %v1383_v33 = vmul.f32 %v2419_v8, %v1382_v16  ;;  %v1385_v49 = vmul.f32 %v2501_v15, %v1382_v16  ;;  %v1405_v36 = vstv %s2604_s30  ;;  %v1340_v30 = vsel %vm303_vm0, %v1338_v19, %v1339_v26  ;;  %s2788_s30 = sld [smem:[#allocation2 + $0x4b]] }
  0xf3   : > { %v566_v13 = vpop.permute.xlu0 %565  ;;  %v1067_v11 = vrot.slane %v1059_v29, 2  ;;  %v1068_v27 = vrot.slane %v1061_v28, 2  ;;  %v1407_v38 = vmul.f32 %v2358_v39, %v1405_v36  ;;  %v1409_v44 = vmul.f32 %v2361_v40, %v1405_v36 }
  0xf4   : > { %v569_v58 = vsel %vm227_vm2, %v566_v13, %v568_v48  ;;  %1295 = vrot.lane.b32.xlu1 %v1291_v43, %s1968_s10  ;;  %v1395_v43 = vrot.slane %v1386_v32, 2  ;;  %v1391_v53 = vrot.slane %v1383_v33, 2  ;;  %v1392_v54 = vrot.slane %v1385_v49, 2 }
  0xf5   : > { %v571_v6 = vadd.f32 %v569_v58, %v502_v55  ;;  %1274 = vrot.lane.b32.xlu0 %v1271_v46, %s1967_s4  ;;  %v1072_v46 = vsel %vm475_vm1, %v1070_v1, %v1071_v5  ;;  %v1069_v55 = vsel %vm475_vm1, %v1067_v11, %v1068_v27  ;;  %v1406_v56 = vmul.f32 %v2419_v8, %v1405_v36 }
  0xf6   : > { %v591_v9 = vpop.permute.xlu1 %590  ;;  %v1408_v57 = vmul.f32 %v2501_v15, %v1405_v36  ;;  %v1428_v58 = vstv %s2621_s5  ;;  %v1418_v17 = vrot.slane %v1409_v44, 2  ;;  %v1393_v3 = vsel %vm475_vm1, %v1391_v53, %v1392_v54  ;;  %s2790_s5 = sld [smem:[#allocation2 + $0x18]] }
  0xf7   : > { %v589_v45 = vpop.permute.xlu0 %588  ;;  %v1430_v7 = vmul.f32 %v2358_v39, %v1428_v58  ;;  %v1414_v10 = vrot.slane %v1406_v56, 2  ;;  %v1429_v0 = vmul.f32 %v2419_v8, %v1428_v58  ;;  %v1431_v51 = vmul.f32 %v2501_v15, %v1428_v58 }
  0xf8   : > { %v592_v59 = vsel %vm267_vm3, %v589_v45, %v591_v9  ;;  %1318 = vrot.lane.b32.xlu1 %v1314_v61, %s1968_s10  ;;  %v1432_v9 = vmul.f32 %v2361_v40, %v1428_v58  ;;  %v1415_v45 = vrot.slane %v1408_v57, 2  ;;  %v653_v1 = vstv %s2651_s8 }
  0xf9   : > { %v2614_v18 = vadd.f32 %v592_v59, %v525_v24  ;;  %1297 = vrot.lane.b32.xlu0 %v1294_v52, %s1968_s10  ;;  %v1384_v24 = vmul.f32 %v2358_v39, %v1382_v16  ;;  %v1451_v52 = vstv %s2634_s6  ;;  %v649_v59 = vstv %s2637_s7  ;;  %s2798_s6 = sld [smem:[#allocation2 + $0x33]] }
  0xfa   : > { %v614_v23 = vpop.permute.xlu1 %613  ;;  %v1441_v19 = vrot.slane %v1432_v9, 2  ;;  %v1452_v26 = vmul.f32 %v2419_v8, %v1451_v52  ;;  %v1454_v29 = vmul.f32 %v2501_v15, %v1451_v52  ;;  %v739_v33 = vstv %s2656_s9  ;;  %s2816_s7 = sld [smem:[#allocation2 + $0x4e]] }
  0xfb   : > { %v612_v31 = vpop.permute.xlu0 %611  ;;  %v1394_v41 = vrot.slane %v1384_v24, 2  ;;  %v1438_v24 = vrot.slane %v1431_v51, 2  ;;  %v657_v54 = vstv %s2668_s11  ;;  %v750_v57 = vstv %s2676_s17  ;;  %s1747_s17 = sshll.u32 %s2014_s16, 7 }
  0xfc   : > { %v615_v25 = vsel %vm267_vm3, %v612_v31, %v614_v23  ;;  %1341 = vrot.lane.b32.xlu1 %v1337_v12, %s1968_s10  ;;  %v1453_v12 = vmul.f32 %v2358_v39, %v1451_v52  ;;  %v1440_v23 = vrot.slane %v1430_v7, 2  ;;  %v1416_v31 = vsel %vm475_vm1, %v1414_v10, %v1415_v45 }
  0xfd   : > { %v2628_v35 = vadd.f32 %v615_v25, %v548_v42  ;;  %1320 = vrot.lane.b32.xlu0 %v1317_v21, %s1968_s10  ;;  %v1396_v2 = vsel %vm475_vm1, %v1394_v41, %v1395_v43  ;;  %v1455_v21 = vmul.f32 %v2361_v40, %v1451_v52  ;;  %v2680_v25 = vld [vmem:[%s2093_s29 + $0x30] sm:$0xff]  ;;  %v1477_v41 = vmul.f32 %v2501_v15, %v2353_v34 }
  0xfe   : > { %v637_v37 = vpop.permute.xlu1 %636  ;;  %v650_v39 = vmul.f32 %v2680_v25, %v649_v59  ;;  %v1463_v32 = vrot.slane %v1453_v12, 2  ;;  %v1442_v49 = vsel %vm475_vm1, %v1440_v23, %v1441_v19  ;;  %v654_v43 = vmul.f32 %v2680_v25, %v653_v1 }
  0xff   : > { %v635_v62 = vpop.permute.xlu0 %634  ;;  %v1464_v36 = vrot.slane %v1455_v21, 2  ;;  %v740_v44 = vmul.f32 %v2680_v25, %v739_v33  ;;  %v751_v10 = vmul.f32 %v2680_v25, %v750_v57 }
 0x100   : > { %v638_v42 = vsel %vm267_vm3, %v635_v62, %v637_v37  ;;  %1052 = vrot.lane.b32.xlu1 %v1049_v47, %s1968_s10  ;;  %v1437_v47 = vrot.slane %v1429_v0, 2  ;;  %v1460_v37 = vrot.slane %v1452_v26, 2  ;;  %v1475_v62 = vmul.f32 %v2419_v8, %v2353_v34 }
 0x101   : > { %v2643_v48 = vadd.f32 %v638_v42, %v571_v6  ;;  %1343 = vrot.lane.b32.xlu0 %v1340_v30, %s1968_s10  ;;  %v1417_v6 = vrot.slane %v1407_v38, 2  ;;  %v1461_v30 = vrot.slane %v1454_v29, 2  ;;  %v1465_v34 = vsel %vm475_vm1, %v1463_v32, %v1464_v36 }
 0x102   : > { %v669_v13 = vpop.permute.xlu1 %668  ;;  %v1439_v27 = vsel %vm475_vm1, %v1437_v47, %v1438_v24  ;;  %v744_v9 = vrot.slane %v740_v44, 1  ;;  %v761_v0 = vstv %s2687_s19  ;;  %v755_v26 = vrot.slane %v751_v10, 1 }
 0x103   : > { %v667_v61 = vpop.permute.xlu0 %666  ;;  %v1419_v16 = vsel %vm475_vm1, %v1417_v6, %v1418_v17  ;;  %v1462_v56 = vsel %vm475_vm1, %v1460_v37, %v1461_v30  ;;  %v1500_v6 = vmul.f32 %v2501_v15, %v2379_v50  ;;  %v762_v23 = vmul.f32 %v2680_v25, %v761_v0 }
 0x104   : > { %v670_v63 = vsel %vm227_vm2, %v667_v61, %v669_v13  ;;  %1075 = vrot.lane.b32.xlu1 %v1072_v46, %s1968_s10  ;;  %v2699_v46 = vld [vmem:[%s2093_s29 + $0x40] sm:$0x3]  ;;  %v1483_v61 = vrot.slane %v1475_v62, 2 }
 0x105   : > { %1073 = vrot.lane.b32.xlu0 %v1069_v55, %s1968_s10  ;;  %v672_v42 = vadd.f32 %v670_v63, %v650_v39  ;;  %v741_v53 = vmul.f32 %v2699_v46, %v739_v33  ;;  %v1484_v63 = vrot.slane %v1477_v41, 2  ;;  %v752_v45 = vmul.f32 %v2699_v46, %v750_v57 }
 0x106   : > { %v682_v22 = vpop.permute.xlu1 %681 }
 0x107   : > { %v680_v14 = vpop.permute.xlu0 %679  ;;  %v745_v52 = vrot.slane %v741_v53, 1  ;;  %v756_v29 = vrot.slane %v752_v45, 1 }
 0x108   : > { %v683_v4 = vsel %vm227_vm2, %v680_v14, %v682_v22  ;;  %1399 = vrot.lane.b32.xlu1 %v1396_v2, %s1967_s4  ;;  %v1498_v2 = vmul.f32 %v2419_v8, %v2379_v50  ;;  %v1485_v50 = vsel %vm475_vm1, %v1483_v61, %v1484_v63 }
 0x109   : > { %1397 = vrot.lane.b32.xlu0 %v1393_v3, %s1967_s4  ;;  %v685_v17 = vadd.f32 %v683_v4, %v654_v43  ;;  %v658_v3 = vmul.f32 %v2680_v25, %v657_v54  ;;  %v1507_v4 = vrot.slane %v1500_v6, 2  ;;  %v746_v21 = vsel %vm303_vm0, %v744_v9, %v745_v52 }
 0x10a   : > { %v695_v28 = vpop.permute.xlu1 %694  ;;  %v1506_v14 = vrot.slane %v1498_v2, 2 }
 0x10b   : > { %v693_v40 = vpop.permute.xlu0 %692 }
 0x10c   : > { %v696_v5 = vsel %vm227_vm2, %v693_v40, %v695_v28  ;;  %1422 = vrot.lane.b32.xlu1 %v1419_v16, %s1967_s4  ;;  %v763_v28 = vmul.f32 %v2699_v46, %v761_v0  ;;  %v1508_v24 = vsel %vm475_vm1, %v1506_v14, %v1507_v4 }
 0x10d   : > { %1420 = vrot.lane.b32.xlu0 %v1416_v31, %s1967_s4  ;;  %v698_v16 = vadd.f32 %v696_v5, %v658_v3  ;;  %v757_v5 = vsel %vm303_vm0, %v755_v26, %v756_v29 }
 0x10e   : > { %v708_v11 = vpop.permute.xlu1 %707  ;;  %v767_v32 = vrot.slane %v763_v28, 1 }
 0x10f   : > { %v706_v38 = vpop.permute.xlu0 %705 }
 0x110   : > { %v709_v13 = vsel %vm267_vm3, %v706_v38, %v708_v11  ;;  %1445 = vrot.lane.b32.xlu1 %v1442_v49, %s1967_s4 }
 0x111   : > { %v711_v55 = vadd.f32 %v709_v13, %v672_v42  ;;  %1443 = vrot.lane.b32.xlu0 %v1439_v27, %s1967_s4  ;;  %s1703_s4 = sld [smem:[#allocation2 + $0xf]] }
 0x112   : > { %v721_v58 = vpop.permute.xlu1 %720 }
 0x113   : > { %v719_v7 = vpop.permute.xlu0 %718  ;;  %v748_v39 = vadd.f32 %v746_v21, %v711_v55 }
 0x114   : > { %v722_v22 = vsel %vm267_vm3, %v719_v7, %v721_v58  ;;  %1468 = vrot.lane.b32.xlu1 %v1465_v34, %s1968_s10  ;;  %v921_v34 = vstv %s1704_s20  ;;  %v932_v7 = vstv %s1705_s24  ;;  %s2877_s20 = scalar_lea.hbm %s2925_s3, %s1747_s17 }
 0x115   : > { %v724_v51 = vadd.f32 %v722_v22, %v685_v17  ;;  %1466 = vrot.lane.b32.xlu0 %v1462_v56, %s1968_s10  ;;  %v922_v61 = vmul.f32 %v2680_v25, %v921_v34  ;;  %v923_v63 = vmul.f32 %v2699_v46, %v921_v34 }
 0x116   : > { %v734_v59 = vpop.permute.xlu1 %733 }
 0x117   : > { %v732_v12 = vpop.permute.xlu0 %731  ;;  %v759_v36 = vadd.f32 %v757_v5, %v724_v51  ;;  %v910_v38 = vstv %s1703_s4  ;;  %v926_v22 = vrot.slane %v922_v61, 2  ;;  %v927_v10 = vrot.slane %v923_v63, 2 }
 0x118   : > { %v735_v19 = vsel %vm267_vm3, %v732_v12, %v734_v59  ;;  %1491 = vrot.lane.b32.xlu1 %v2397_v60, %s1968_s10  ;;  %v766_v60 = vrot.slane %v762_v23, 1  ;;  %v911_v13 = vmul.f32 %v2680_v25, %v910_v38  ;;  %v912_v55 = vmul.f32 %v2699_v46, %v910_v38 }
 0x119   : > { %v737_v31 = vadd.f32 %v735_v19, %v698_v16  ;;  %1489 = vrot.lane.b32.xlu0 %v1485_v50, %s1968_s10  ;;  %v933_v51 = vmul.f32 %v2680_v25, %v932_v7  ;;  %v934_v59 = vmul.f32 %v2699_v46, %v932_v7  ;;  %v928_v21 = vsel %vm475_vm1, %v926_v22, %v927_v10 }
 0x11a   : > { %v790_v47 = vpop.permute.xlu1 %789  ;;  %v768_v11 = vsel %vm303_vm0, %v766_v60, %v767_v32  ;;  %v915_v6 = vrot.slane %v911_v13, 2  ;;  %v916_v17 = vrot.slane %v912_v55, 2  ;;  %v1189_v10 = vstv %s1728_s28 }
 0x11b   : > { %v788_v40 = vpop.permute.xlu0 %787  ;;  %v770_v41 = vadd.f32 %v768_v11, %v737_v31  ;;  %v937_v23 = vrot.slane %v933_v51, 2  ;;  %v938_v19 = vrot.slane %v934_v59, 2  ;;  %v1092_v59 = vstv %s2780_s26 }
 0x11c   : > { %v791_v1 = vsel %vm227_vm2, %v788_v40, %v790_v47  ;;  %1514 = vrot.lane.b32.xlu1 %v2431_v20, %s1968_s10  ;;  %v917_v0 = vsel %vm475_vm1, %v915_v6, %v916_v17 }
 0x11d   : > { %v793_v33 = vadd.f32 %v791_v1, %v748_v39  ;;  %1512 = vrot.lane.b32.xlu0 %v1508_v24, %s1968_s10  ;;  %v939_v25 = vsel %vm475_vm1, %v937_v23, %v938_v19  ;;  %s1727_s10 = sld [smem:[#allocation2 + $0x15]]  ;;  %v1835_v19 = vld [vmem:[%s2093_s29 + $0x60] sm:$0xff]  ;;  %s186_s29 = sand.u32 1, %s1952_s13  }
 0x11e   : > { %v813_v49 = vpop.permute.xlu1 %812  ;;  %s1753_s8 = smul.u32 24, %s186_s29  ;;  %s2882_s24 = scalar_lea.sflag [#allocation4], %s186_s29 }
 0x11f   : > { %v811_v37 = vpop.permute.xlu0 %810 }
 0x120   : > { %v814_v30 = vsel %vm227_vm2, %v811_v37, %v813_v49  ;;  %s188_s9 = scalar_lea.vmem [#allocation9], %s1753_s8 }
 0x121   : > { %v816_v27 = vadd.f32 %v814_v30, %v759_v36  ;;  %s1543_s11 = sshll.u32 %s188_s9, 4  ;;  %s2872_s11 = int_to_ptr.vmem [resolvable:$true] %s1543_s11 }
 0x122   : > { %v836_v62 = vpop.permute.xlu1 %835  ;;  %s1888_s16 = scalar_lea.vmem %s2872_s11, 384 }
 0x123   : > { %v834_v20 = vpop.permute.xlu0 %833  ;;  %p1889_p3 = scmp.ne.s32.totalorder %s2872_s11, %s1888_s16 }
 0x124   : > { %v837_v42 = vsel %vm227_vm2, %v834_v20, %v836_v62 }
 0x125   : > { %v839_v43 = vadd.f32 %v837_v42, %v770_v41  ;;  %p1890_p7 = pnand %p1889_p3, %p2940_p4 }
 0x126   : > { %v859_v44 = vpop.permute.xlu1 %858 }
 0x127   : > { %v857_v53 = vpop.permute.xlu0 %856  ;;  %p1891_p8 = pneg %p1890_p7 }
 0x128   : > { %v860_v54 = vsel %vm267_vm3, %v857_v53, %v859_v44 }
 0x129   : > { %v862_v56 = vadd.f32 %v860_v54, %v793_v33 }
 0x12a   : > { %v882_v57 = vpop.permute.xlu1 %881 }
 0x12b   : > { %v880_v58 = vpop.permute.xlu0 %879  ;;  %v919_v4 = vadd.f32 %v917_v0, %v862_v56 }
 0x12c   : > { %v883_v2 = vsel %vm267_vm3, %v880_v58, %v882_v57 }
 0x12d   : > { %v885_v3 = vadd.f32 %v883_v2, %v816_v27  ;;  %v1178_v2 = vstv %s1727_s10  ;;  %s1969_s10 = smov [#allocation9]  }
 0x12e   : > { %v905_v9 = vpop.permute.xlu1 %904  ;;  %v1179_v7 = vmul.f32 %v2419_v8, %v1178_v2 }
 0x12f   : > { %v903_v52 = vpop.permute.xlu0 %902  ;;  %v930_v28 = vadd.f32 %v928_v21, %v885_v3  ;;  %v1088_v3 = vstv %s1718_s25  ;;  %v1349_v21 = vstv %s2790_s5  ;;  %s1892_s25 = sshll.u32 %s1969_s10, 4  ;;  %s1893_s25 = int_to_ptr.vmem [resolvable:$false] %s1892_s25 }
 0x130   : > { %v906_v45 = vsel %vm267_vm3, %v903_v52, %v905_v9  ;;  %v1180_v9 = vmul.f32 %v2501_v15, %v1178_v2  ;;  %v1089_v22 = vmul.f32 %v2419_v8, %v1088_v3  ;;  %v1191_v8 = vmul.f32 %v2501_v15, %v1189_v10  ;;  %s1894_s26 = scalar_lea.vmem %s1893_s25, 768  ;;  %p1895_p11 = scmp.lt.s32.totalorder %s2872_s11, %s1893_s25 }
 0x131   : > { %v908_v50 = vadd.f32 %v906_v45, %v839_v43  ;;  %p1896_p13 = scmp.lt.s32.totalorder %s1894_s26, %s1888_s16 }
 0x132   : > { %v961_v14 = vpop.permute.xlu1 %960 }
 0x133   : > { %v959_v16 = vpop.permute.xlu0 %958  ;;  %v941_v39 = vadd.f32 %v939_v25, %v908_v50  ;;  %v1200_v50 = vstv %s2788_s30  ;;  %p1897_p1 = por %p1896_p13, %p1895_p11 }
 0x134   : > { %v962_v12 = vsel %vm227_vm2, %v959_v16, %v961_v14  ;;  %v1183_v16 = vrot.slane %v1179_v7, 1  ;;  %v1201_v25 = vmul.f32 %v1835_v19, %v1200_v50 }
 0x135   : > { %v964_v26 = vadd.f32 %v962_v12, %v919_v4  ;;  %v1096_v4 = vstv %s2782_s27  ;;  %v1184_v12 = vrot.slane %v1180_v9, 1  ;;  %p1898_p2 = pnand %p1897_p1, %p1891_p8 }
 0x136   : > { %v984_v29 = vpop.permute.xlu1 %983  ;;  %v1205_v3 = vrot.slane %v1201_v25, 1 }
 0x137   : > { %v982_v31 = vpop.permute.xlu0 %981 }
 0x138   : > { %v985_v47 = vsel %vm227_vm2, %v982_v31, %v984_v29 }
 0x139   : > { %v987_v24 = vadd.f32 %v985_v47, %v930_v28  ;;  %v1093_v47 = vmul.f32 %v1835_v19, %v1092_v59 }
 0x13a   : > { %v1007_v46 = vpop.permute.xlu1 %1006 }
 0x13b   : > { %v1005_v40 = vpop.permute.xlu0 %1004 }
 0x13c   : > { %v1008_v1 = vsel %vm227_vm2, %v1005_v40, %v1007_v46 }
 0x13d   : > { %v2752_v5 = vadd.f32 %v1008_v1, %v941_v39  ;;  %v1350_v1 = vmul.f32 %v1835_v19, %v1349_v21 }
 0x13e   : > { %v1030_v60 = vpop.permute.xlu1 %1029 }
 0x13f   : > { %v1028_v32 = vpop.permute.xlu0 %1027 }
 0x140   : > { %v1031_v33 = vsel %vm267_vm3, %v1028_v32, %v1030_v60  ;;  %v1351_v60 = vmul.f32 %v2501_v15, %v1349_v21  ;;  %v1097_v32 = vmul.f32 %v1835_v19, %v1096_v4 }
 0x141   : > { %v1033_v49 = vadd.f32 %v1031_v33, %v964_v26  ;;  %v1190_v26 = vmul.f32 %v1835_v19, %v1189_v10  ;;  %v1185_v33 = vsel %vm303_vm0, %v1183_v16, %v1184_v12 }
 0x142   : > { %v1106_v36 = vpop.permute.xlu1 %1105 }
 0x143   : > { %v2756_v37 = vadd.f32 %v1033_v49, %v2614_v18  ;;  %v1051_v30 = vpop.permute.xlu0 %1050 }
 0x146   : > { %v1119_v11 = vpop.permute.xlu1 %1118 }
 0x147   : > { %v1108_v27 = vpop.permute.xlu0 %1107 }
 0x148   : > { %v1109_v51 = vsel %vm227_vm2, %v1106_v36, %v1108_v27  ;;  %v1195_v27 = vrot.slane %v1191_v8, 1 }
 0x149   : > { %v1111_v31 = vadd.f32 %v1109_v51, %v1089_v22 }
 0x14a   : > { %v2758_v62 = vpop.permute.xlu1 %1131 }
 0x14b   : > { %v1121_v41 = vpop.permute.xlu0 %1120 }
 0x14c   : > { %v1122_v39 = vsel %vm227_vm2, %v1119_v11, %v1121_v41 }
 0x14d   : > { %v1124_v2 = vadd.f32 %v1122_v39, %v1093_v47 }
 0x14e   : > { %v1145_v20 = vpop.permute.xlu1 %1144 }
 0x14f   : > { %v2760_v42 = vpop.permute.xlu0 %1133 }
 0x150   : > { %v1135_v9 = vsel %vm227_vm2, %v2758_v62, %v2760_v42 }
 0x151   : > { %v1137_v59 = vadd.f32 %v1135_v9, %v1097_v32 }
 0x152   : > { %v1158_v43 = vpop.permute.xlu1 %1157 }
 0x153   : > { %v1147_v38 = vpop.permute.xlu0 %1146 }
 0x154   : > { %v1148_v23 = vsel %vm267_vm3, %v1145_v20, %v1147_v38  ;;  %v1360_v38 = vstv %s2798_s6 }
 0x155   : > { %v1361_v10 = vmul.f32 %v1835_v19, %v1360_v38  ;;  %v1362_v42 = vmul.f32 %v2501_v15, %v1360_v38 }
 0x156   : > { %v2762_v44 = vpop.permute.xlu1 %1170 }
 0x157   : > { %v1160_v53 = vpop.permute.xlu0 %1159  ;;  %v1366_v21 = vrot.slane %v1362_v42, 2 }
 0x158   : > { %v1161_v36 = vsel %vm267_vm3, %v1158_v43, %v1160_v53  ;;  %v1354_v43 = vrot.slane %v1350_v1, 2  ;;  %v1355_v53 = vrot.slane %v1351_v60, 2 }
 0x15a   : > { %v2764_v54 = vpop.permute.xlu1 %1226 }
 0x15b   : > { %v2766_v13 = vpop.permute.xlu0 %1172 }
 0x15e   : > { %v2768_v18 = vpop.permute.xlu1 %1249 }
 0x15f   : > { %v2770_v55 = vpop.permute.xlu0 %1228 }
 0x162   : > { %v2772_v34 = vpop.permute.xlu1 %1272 }
 0x163   : > { %v2774_v56 = vpop.permute.xlu0 %1251 }
 0x166   : > { %v2776_v57 = vpop.permute.xlu1 %1295 }
 0x167   : > { %v2778_v58 = vpop.permute.xlu0 %1274 }
 0x16a   : > { %v2784_v61 = vpop.permute.xlu1 %1318 }
 0x16b   : > { %v2786_v63 = vpop.permute.xlu0 %1297 }
 0x16c   : > { %v1299_v51 = vsel %vm267_vm3, %v2776_v57, %v2786_v63  ;;  %v1365_v57 = vrot.slane %v1361_v10, 2 }
 0x16e   : > { %v2792_v6 = vpop.permute.xlu1 %1341 }
 0x16f   : > { %v2794_v17 = vpop.permute.xlu0 %1320 }
 0x170   : > { %v1322_v63 = vsel %vm267_vm3, %v2784_v61, %v2794_v17  ;;  %v1367_v17 = vsel %vm475_vm1, %v1365_v57, %v1366_v21 }
 0x172   : > { %v1053_v52 = vpop.permute.xlu1 %1052 }
 0x173   : > { %v1054_v45 = vsel %vm267_vm3, %v1051_v30, %v1053_v52  ;;  %v2802_v0 = vpop.permute.xlu0 %1343  ;;  %v1194_v30 = vrot.slane %v1190_v26, 1  ;;  %v1163_v52 = vadd.f32 %v1161_v36, %v1124_v2 }
 0x174   : > { %v1056_v14 = vadd.f32 %v1054_v45, %v987_v24  ;;  %v1202_v24 = vmul.f32 %v2501_v15, %v1200_v50  ;;  %v1371_v50 = vstv %s2816_s7  ;;  %v1345_v61 = vsel %vm267_vm3, %v2792_v6, %v2802_v0 }
 0x175   : > { %v1196_v45 = vsel %vm303_vm0, %v1194_v30, %v1195_v27  ;;  %v1372_v26 = vmul.f32 %v1835_v19, %v1371_v50  ;;  %v1373_v8 = vmul.f32 %v2501_v15, %v1371_v50 }
 0x176   : > { %v2813_v29 = vadd.f32 %v1056_v14, %v2628_v35  ;;  %v1076_v28 = vpop.permute.xlu1 %1075  ;;  %v1150_v35 = vadd.f32 %v1148_v23, %v1111_v31  ;;  %v1206_v11 = vrot.slane %v1202_v24, 1  ;;  %v1253_v14 = vsel %vm227_vm2, %v2768_v18, %v2774_v56 }
 0x177   : > { %v1074_v46 = vpop.permute.xlu0 %1073  ;;  %v1198_v16 = vadd.f32 %v1196_v45, %v1163_v52  ;;  %v1276_v56 = vsel %vm227_vm2, %v2772_v34, %v2778_v58  ;;  %v1376_v19 = vrot.slane %v1372_v26, 2  ;;  %v1377_v15 = vrot.slane %v1373_v8, 2 }
 0x178   : > { %v1077_v40 = vsel %vm267_vm3, %v1074_v46, %v1076_v28  ;;  %v1187_v22 = vadd.f32 %v1185_v33, %v1150_v35 }
 0x179   : > { %v1079_v49 = vadd.f32 %v1077_v40, %v2752_v5  ;;  %v1230_v5 = vsel %vm227_vm2, %v2764_v54, %v2770_v55  ;;  %v1255_v28 = vadd.f32 %v1253_v14, %v1198_v16  ;;  %v1378_v33 = vsel %vm475_vm1, %v1376_v19, %v1377_v15 }
 0x17a   : > { %v1400_v20 = vpop.permute.xlu1 %1399  ;;  %v1232_v54 = vadd.f32 %v1230_v5, %v1187_v22 }
 0x17b   : > { %v2826_v41 = vadd.f32 %v1079_v49, %v2643_v48  ;;  %v1398_v7 = vpop.permute.xlu0 %1397  ;;  %v1174_v48 = vsel %vm267_vm3, %v2762_v44, %v2766_v13  ;;  %v1207_v44 = vsel %vm303_vm0, %v1205_v3, %v1206_v11  ;;  %v1356_v13 = vsel %vm475_vm1, %v1354_v43, %v1355_v53 }
 0x17c   : > { %v1176_v4 = vadd.f32 %v1174_v48, %v1137_v59  ;;  %v1301_v12 = vadd.f32 %v1299_v51, %v1232_v54  ;;  %v1401_v31 = vsel %vm227_vm2, %v1398_v7, %v1400_v20  ;;  %v1324_v25 = vadd.f32 %v1322_v63, %v1255_v28 }
 0x17e   : > { %v1423_v62 = vpop.permute.xlu1 %1422  ;;  %v1209_v47 = vadd.f32 %v1207_v44, %v1176_v4  ;;  %v1358_v24 = vadd.f32 %v1356_v13, %v1301_v12  ;;  %v1369_v32 = vadd.f32 %v1367_v17, %v1324_v25 }
 0x17f   : > { %v1421_v55 = vpop.permute.xlu0 %1420 }
 0x180   : > { %v1278_v39 = vadd.f32 %v1276_v56, %v1209_v47  ;;  %v1403_v40 = vadd.f32 %v1401_v31, %v1358_v24  ;;  %v1424_v34 = vsel %vm227_vm2, %v1421_v55, %v1423_v62 }
 0x181   : > { %v1426_v0 = vadd.f32 %v1424_v34, %v1369_v32 }
 0x182   : > { %v1446_v23 = vpop.permute.xlu1 %1445  ;;  %v1347_v60 = vadd.f32 %v1345_v61, %v1278_v39 }
 0x183   : > { %v1444_v18 = vpop.permute.xlu0 %1443 }
 0x184   : > { %v1447_v30 = vsel %vm227_vm2, %v1444_v18, %v1446_v23  ;;  %v1380_v20 = vadd.f32 %v1378_v33, %v1347_v60 }
 0x186   : > { %v1469_v46 = vpop.permute.xlu1 %1468  ;;  %v1449_v3 = vadd.f32 %v1447_v30, %v1380_v20 }
 0x187   : > { %v1467_v1 = vpop.permute.xlu0 %1466 }
 0x188   : > { %v1470_v58 = vsel %vm267_vm3, %v1467_v1, %v1469_v46 }
 0x189   : > { %v1472_v35 = vadd.f32 %v1470_v58, %v1403_v40 }
 0x18a   : > { %v1492_v6 = vpop.permute.xlu1 %1491 }
 0x18b   : > { %v1520_v49 = vadd.f32 %v2756_v37, %v1472_v35  ;;  %v1490_v36 = vpop.permute.xlu0 %1489 }
 0x18c   : > { %v1493_v27 = vsel %vm267_vm3, %v1490_v36, %v1492_v6 }
 0x18d   : > { %1521 = vst [vmem:[%s188_s9] sm:$0xff] %v1520_v49  ;;  %v1495_v38 = vadd.f32 %v1493_v27, %v1426_v0 }
 0x18e   : > { %v1515_v2 = vpop.permute.xlu1 %1514 }
 0x18f   : > { %v1523_v11 = vadd.f32 %v2813_v29, %v1495_v38  ;;  %v1513_v7 = vpop.permute.xlu0 %1512 }
 0x190   : > { %v1516_v37 = vsel %vm267_vm3, %v1513_v7, %v1515_v2 }
 0x191   : > { %1745 = vst [vmem:[%s188_s9 + $0x8] sm:$0xff] %v1523_v11  ;;  %v1518_v9 = vadd.f32 %v1516_v37, %v1449_v3 }
 0x193   : > { %v1527_v5 = vadd.f32 %v2826_v41, %v1518_v9 }
 0x195   : > { %1746 = vst [vmem:[%s188_s9 + $0x10] sm:$0xff] %v1527_v5 }
 0x196   : > { %1901 = shalt.err (!%p1898_p2)
}
 0x197   : > { %s1902_s27 = scalar_lea.hbm %s2877_s20, 384  ;;  %s1906_s5 = scalar_lea.hbm %s2925_s3, 768 }
 0x198   : > { %p1903_p10 = scmp.ne.s32.totalorder %s2877_s20, %s1902_s27  ;;  %p1907_p6 = scmp.lt.s32.totalorder %s2877_s20, %s2925_s3 }
 0x199   : > { %p1908_p9 = scmp.lt.s32.totalorder %s1906_s5, %s1902_s27 }
 0x19a   : > { %p1904_p0 = pnand %p1903_p10, %p2940_p4 }
 0x19b   : > { %p1909_p12 = por %p1908_p9, %p1907_p6 }
 0x19c   : > { %p1905_p5 = pneg %p1904_p0 }
 0x19e   : > { %p1910_p3 = pnand %p1909_p12, %p1905_p5 }
 0x1a0   : > { %1913 = shalt.err (!%p1910_p3)
}
 0x1a1   : > { %s1970_s29 = smov 128   ;;  %s1971_s8 = smov 256  }
 0x1a2   : > { %s1972_s9 = smov 8  }
 0x1a3   : > { %1766 = dma.vmem_to_hbm [thread:$0]  (%p2940_p4), %s2872_s11, 384, %s2877_s20, %s2882_s24, %s1970_s29, %s1971_s8, %s1972_s9  }
 0x1a4 PF: > { %p1788_p7 = scmp.ge.s32.totalorder %s1960_s15, 2  ;;  %s1558_s17 = sand.u32 1, %s1948_s12  }
 0x1a5   : > { %p2941_p8 = scmp.ne.s32.totalorder %s2930_s23, 0  ;;  %s1559_s19 = scalar_lea.sflag [#allocation4], %s1558_s17 }
 0x1a7   : > { %p1779_p11 = pnand %p1788_p7, %p2941_p8 }
 0x1a9   : > { %p1780_p13 = pneg %p1779_p11 }
 0x1ab   : > { %1943 = dma.done.wait (%p1780_p13), %s1559_s19, 384  }
 0x1ac   : > { %1945 = vsyncadd (%p1780_p13), %s1559_s19, 4294966912  ;;  %p16_p1 = scmp.ge.s32.totalorder %s2018_s18, 4   ;;  %s2942_s12 = smov %s1952_s13 }
 0x1ad   : > { %s2943_s13 = smov %s1956_s14  ;;  %s2944_s14 = smov %s2029_s21 }
 0x1ae   : > { %s2945_s15 = smov %s2018_s18  ;;  %18 = sbr.rel (!%p16_p1) target bundleno = 6 (0x6), region = 84 }
 0x1b3   :  { %1564 = vsyncpa [#allocation3], 1 }
 0x1b4   :  { %1566 = vsyncpa [#allocation3 + $0x1], 1 }
 0x1b5   :  { %1567 = vsyncpa [#allocation4], 1 }
 0x1b6   :  { %1569 = vsyncpa [#allocation4 + $0x1], 1 }
 0x1b7   :  { %1570 = vsyncpa [#allocation5], 1 }
 0x1b8   :  { %1572 = vsyncpa [#allocation5 + $0x1], 1 }
 0x1b9   :  { %1573 = vsyncpa [#allocation6], 1 }
 0x1ba   :  { %1575 = vsyncpa [#allocation6 + $0x1], 1 }

</bundles_post_ra>
